<compile_context>
chip_gen: v7x
topology: tpu7x:2x2x1
jax: 0.10.0
libtpu: 0.0.40
codegen_flags: <defaults>
</compile_context>

<pallas_src>
import numpy as np
import jax
import jax.numpy as jnp
from jax.experimental import pallas as pl
from jax.experimental.pallas import tpu as pltpu

# ---------------- module config ----------------
QST_DIM = 8
DEPTH_DIM = 24
D_IN = DEPTH_DIM + QST_DIM          # 32: per-object feature dim fed to apsi1 / g1
UNITS = 32                          # units_per_MLP_layer
WITH_LN_GENERATOR = True
WITH_LEAKY_RELU = False
WITH_SOFTMAX_WEIGHTS = True
DROPOUT_P = 0.5
LN_EPS = 1e-5

BATCH = 2
FEATSIZE = 16                       # featuresize (e.g. a 4x4 grid of objects)


# ---------------- shared math helpers (used in kernel AND reference) ----------------
def _nonlin(x):
    if WITH_LEAKY_RELU:
        return jnp.where(x > 0, x, 0.01 * x)
    return jnp.maximum(x, 0.0)


def _layernorm(x, gamma, beta):
    mu = jnp.mean(x, axis=-1, keepdims=True)
    var = jnp.mean(jnp.square(x - mu), axis=-1, keepdims=True)
    return (x - mu) * jax.lax.rsqrt(var + LN_EPS) * gamma + beta


def _dot(a, b):
    # Single-pass bf16 MXU matmul with f32 accumulation.  The same cast is applied
    # in the reference (weights in the packed slab are already bf16 -> the cast is
    # a no-op there) so rounding of the operands matches exactly.
    return jnp.dot(a.astype(jnp.bfloat16), b.astype(jnp.bfloat16),
                   preferred_element_type=jnp.float32)


# ---------------- Pallas kernel ----------------
def sarn_kernel(ojqst_ref, w_ref, v_ref, out_ref):
    B, F, D = ojqst_ref.shape
    U = UNITS

    oj3 = ojqst_ref[...]                            # (B, F, D)
    oj2 = oj3.reshape(B * F, D)                     # batched objects for all matmuls

    # ---- carve weights from the packed bf16 slab (static, tile-aligned slices) ----
    # row block 0: [aw1 | gw1_oj] (fused first layer, full 2U lanes)
    # row blocks 1..6: aw2, gw1_oi, gw2, gw3, fw1, fw2 in lanes 0:U (lanes U:2U are zero pad)
    w_fused = w_ref[0:D, :]                         # (D, 2U)
    off = D
    aw2 = w_ref[off:off + U, :U]; off += U
    gw1_oi = w_ref[off:off + D, :U]; off += D
    gw2 = w_ref[off:off + U, :U]; off += U
    gw3 = w_ref[off:off + U, :U]; off += U
    fw1 = w_ref[off:off + U, :U]; off += U
    fw2 = w_ref[off:off + U, :U]

    def v(i):
        return v_ref[i:i + 1, :]                    # (1, U) f32 row
    (ab1, ag1, abe1, ab2, ag2, abe2, aw3,
     gb1, gg1, gbe1, gb2, gg2, gbe2, gb3, gg3, gbe3,
     fb1, fb2, ab3_row) = (v(i) for i in range(19))
    drop_mask = v_ref[19:19 + B, :]                 # (B, U) f32
    ab3 = ab3_row[:, 0:1]                           # (1, 1) scalar bias of apsi3

    # ---- fused first layer: ONE MXU pass feeds both the attention MLP and applyG ----
    first = _dot(oj2, w_fused)                      # (B*F, 2U) f32
    h = _nonlin(first[:, :U] + ab1)                 # attention half (lanes 0:U)
    g_oj = first[:, U:]                             # g-path half   (lanes U:2U)

    # ---- applyAPsi: per-object attention logits, all B*F objects at once ----
    h = _layernorm(h, ag1, abe1)
    h = _nonlin(_dot(h, aw2) + ab2)
    h = _layernorm(h, ag2, abe2)
    logit = jnp.sum(h.reshape(B, F, U) * aw3, axis=-1, keepdims=True) + ab3   # (B, F, 1)
    logit = _nonlin(logit)

    # ---- exact softmax over objects + attention-weighted object summary ----
    lmax = jnp.max(logit, axis=1, keepdims=True)
    e = jnp.exp(logit - lmax)
    denom = jnp.sum(e, axis=1, keepdims=True)
    attn = e / denom                                # exact divide (matches reference)
    weights = attn if WITH_SOFTMAX_WEIGHTS else logit
    oi = jnp.sum(weights * oj3, axis=1)             # (B, D)

    # ---- applyG: gw1 split into oi/oj halves -> no concat / no F-row broadcast ----
    g_oi = _dot(oi, gw1_oi)                         # (B, U), contracted once per batch
    g = _nonlin(g_oj.reshape(B, F, U) + g_oi[:, None, :] + gb1).reshape(B * F, U)
    if WITH_LN_GENERATOR:
        g = _layernorm(g, gg1, gbe1)
    g = _nonlin(_dot(g, gw2) + gb2)
    if WITH_LN_GENERATOR:
        g = _layernorm(g, gg2, gbe2)
    g = _nonlin(_dot(g, gw3) + gb3)
    if WITH_LN_GENERATOR:
        g = _layernorm(g, gg3, gbe3)

    sumg = jnp.sum(g.reshape(B, F, U), axis=1)      # (B, U)

    # ---- applyF (f3 exists in __init__ but is never used in the torch forward) ----
    f = _nonlin(_dot(sumg, fw1) + fb1)
    f = _dot(f, fw2) + fb2
    f = f * drop_mask                               # training-mode dropout (precomputed mask)
    f = _nonlin(f)
    if WITH_LEAKY_RELU:
        f = _nonlin(f)                              # second nonlin only matters for leaky
    out_ref[...] = f                                # single lane-contiguous (B, U) store


# ---------------- wrapper ----------------
def sarn_forward(ojqst, w_slab, v_slab):
    B, F, D = ojqst.shape
    U = UNITS
    nw, ww = w_slab.shape
    nv = v_slab.shape[0]

    grid_spec = pltpu.PrefetchScalarGridSpec(
        num_scalar_prefetch=0,
        grid=(1,),                                               # whole problem in one step
        in_specs=[
            pl.BlockSpec((B, F, D), lambda i: (0, 0, 0)),        # ojqst
            pl.BlockSpec((nw, ww), lambda i: (0, 0)),            # packed bf16 weight slab
            pl.BlockSpec((nv, U), lambda i: (0, 0)),             # packed f32 bias/LN/mask slab
        ],
        out_specs=pl.BlockSpec((B, U), lambda i: (0, 0)),
    )

    # Advisory cost estimate so XLA can overlap this tiny call with neighbours.
    flops = 2 * (B * F * D * (2 * U)        # fused first layer
                 + 3 * B * F * U * U        # aw2, gw2, gw3
                 + B * D * U                # gw1_oi
                 + 2 * B * U * U)           # fw1, fw2
    bytes_accessed = (ojqst.size * ojqst.dtype.itemsize
                      + w_slab.size * w_slab.dtype.itemsize
                      + v_slab.size * v_slab.dtype.itemsize
                      + B * U * 4)
    cost = pl.CostEstimate(flops=flops, transcendentals=6 * B * F,
                           bytes_accessed=bytes_accessed)

    # TODO(synk): if B (or a time axis) grows in production, make it a grid axis
    # marked "parallel" with weight/bias index_maps held at (0, 0) so the slabs stay
    # VMEM-resident and v7x's two TensorCores both get work; at B=2 one step is fastest.
    return pl.pallas_call(
        sarn_kernel,
        out_shape=jax.ShapeDtypeStruct((B, U), jnp.float32),
        grid_spec=grid_spec,
        compiler_params=pltpu.CompilerParams(dimension_semantics=("arbitrary",)),
        cost_estimate=cost,
    )(ojqst, w_slab, v_slab)


# ---------------- parameter packing ----------------
def pack_params(P, drop_mask):
    U, D = UNITS, D_IN

    def pad_right(w):                                # (r, U) -> (r, 2U), zeros in lanes U:2U
        return jnp.concatenate([w, jnp.zeros_like(w)], axis=1)

    w_slab = jnp.concatenate([
        jnp.concatenate([P["aw1"], P["gw1"][D:]], axis=1),   # fused [aw1 | gw1_oj] (D, 2U)
        pad_right(P["aw2"]),
        pad_right(P["gw1"][:D]),                             # gw1_oi
        pad_right(P["gw2"]),
        pad_right(P["gw3"]),
        pad_right(P["fw1"]),
        pad_right(P["fw2"]),
    ], axis=0).astype(jnp.bfloat16)                          # (D + 6U, 2U) bf16, pre-cast

    ab3_row = jnp.broadcast_to(P["ab3"].reshape(1, 1), (1, U))
    v_slab = jnp.concatenate([
        P["ab1"], P["ag1"], P["abe1"],
        P["ab2"], P["ag2"], P["abe2"],
        P["aw3"],
        P["gb1"], P["gg1"], P["gbe1"],
        P["gb2"], P["gg2"], P["gbe2"],
        P["gb3"], P["gg3"], P["gbe3"],
        P["fb1"], P["fb2"],
        ab3_row,
        drop_mask.astype(jnp.float32),
    ], axis=0).astype(jnp.float32)                           # (19 + B, U) f32
    return w_slab, v_slab


# ---------------- pure-JAX reference (for verification) ----------------
def reference_forward(ojqst, drop_mask, P):
    oj = ojqst                                                  # (B, F, D)

    h = _nonlin(_dot(oj, P["aw1"]) + P["ab1"])
    h = _layernorm(h, P["ag1"], P["abe1"])
    h = _nonlin(_dot(h, P["aw2"]) + P["ab2"])
    h = _layernorm(h, P["ag2"], P["abe2"])
    w = _nonlin(jnp.sum(h * P["aw3"], axis=-1, keepdims=True) + P["ab3"])   # (B, F, 1)

    # softmax over the object axis, same formulation as the kernel (== F.softmax dim=1)
    wmax = jnp.max(w, axis=1, keepdims=True)
    e = jnp.exp(w - wmax)
    attn = e / jnp.sum(e, axis=1, keepdims=True)
    weights = attn if WITH_SOFTMAX_WEIGHTS else w
    oi = jnp.sum(weights * oj, axis=1, keepdims=True)           # (B, 1, D)
    x = jnp.concatenate([jnp.broadcast_to(oi, oj.shape), oj], axis=-1)

    g = _nonlin(_dot(x, P["gw1"]) + P["gb1"])
    if WITH_LN_GENERATOR:
        g = _layernorm(g, P["gg1"], P["gbe1"])
    g = _nonlin(_dot(g, P["gw2"]) + P["gb2"])
    if WITH_LN_GENERATOR:
        g = _layernorm(g, P["gg2"], P["gbe2"])
    g = _nonlin(_dot(g, P["gw3"]) + P["gb3"])
    if WITH_LN_GENERATOR:
        g = _layernorm(g, P["gg3"], P["gbe3"])

    sumg = jnp.sum(g, axis=1)                                   # (B, U)

    f = _nonlin(_dot(sumg, P["fw1"]) + P["fb1"])
    f = _dot(f, P["fw2"]) + P["fb2"]
    f = f * drop_mask
    return _nonlin(_nonlin(f))                                  # faithful double ReLU


# ---------------- deterministic parameter init ----------------
def _xavier_normal(key, fan_in, fan_out):
    std = (2.0 / (fan_in + fan_out)) ** 0.5
    return std * jax.random.normal(key, (fan_in, fan_out), jnp.float32)  # stored as (in, out)


def _bias_init(key, fan_in, fan_out):
    bound = 1.0 / (fan_in ** 0.5)
    return jax.random.uniform(key, (1, fan_out), jnp.float32, -bound, bound)


def init_params(key):
    ks = jax.random.split(key, 16)
    U, D = UNITS, D_IN
    ones = jnp.ones((1, U), jnp.float32)
    zeros = jnp.zeros((1, U), jnp.float32)
    P = {}
    # aPsi MLP
    P["aw1"], P["ab1"] = _xavier_normal(ks[0], D, U), _bias_init(ks[1], D, U)
    P["ag1"], P["abe1"] = ones, zeros
    P["aw2"], P["ab2"] = _xavier_normal(ks[2], U, U), _bias_init(ks[3], U, U)
    P["ag2"], P["abe2"] = ones, zeros
    P["aw3"] = _xavier_normal(ks[4], U, 1).T                    # (1, U): Linear(U, 1) weight row
    P["ab3"] = _bias_init(ks[5], U, 1)                          # (1, 1) scalar bias
    # g MLP
    P["gw1"], P["gb1"] = _xavier_normal(ks[6], 2 * D, U), _bias_init(ks[7], 2 * D, U)
    P["gg1"], P["gbe1"] = ones, zeros
    P["gw2"], P["gb2"] = _xavier_normal(ks[8], U, U), _bias_init(ks[9], U, U)
    P["gg2"], P["gbe2"] = ones, zeros
    P["gw3"], P["gb3"] = _xavier_normal(ks[10], U, U), _bias_init(ks[11], U, U)
    P["gg3"], P["gbe3"] = ones, zeros
    # f MLP (f3 exists in __init__ but is never used in forward -> not needed)
    P["fw1"], P["fb1"] = _xavier_normal(ks[12], U, U), _bias_init(ks[13], U, U)
    P["fw2"], P["fb2"] = _xavier_normal(ks[14], U, U), _bias_init(ks[15], U, U)
    return P


if __name__ == "__main__":
    key = jax.random.PRNGKey(0)
    k_in, k_drop, k_par = jax.random.split(key, 3)

    ojqst = jax.random.normal(k_in, (BATCH, FEATSIZE, D_IN), jnp.float32)

    # TODO(synk): torch F.dropout(training=True) RNG is not bit-reproducible; an
    # equivalent keep/scale mask (p=0.5, scale 1/(1-p)) is precomputed in JAX and
    # applied inside the kernel (could also be drawn in-kernel with pltpu.prng_*).
    keep = jax.random.bernoulli(k_drop, 1.0 - DROPOUT_P, (BATCH, UNITS))
    drop_mask = keep.astype(jnp.float32) / (1.0 - DROPOUT_P)

    params = init_params(k_par)
    w_slab, v_slab = pack_params(params, drop_mask)

    out = sarn_forward(ojqst, w_slab, v_slab)
    out = jax.block_until_ready(out)

    ref = reference_forward(ojqst, drop_mask, params)
    # Kernel and reference share the exact same bf16 casts and exact softmax; the
    # only differences left are f32 accumulation order (gw1 oi/oj split, reduction
    # trees).  atol leaves headroom for near-zero post-ReLU outputs.
    np.testing.assert_allclose(np.asarray(out), np.asarray(ref), rtol=1e-2, atol=2e-2)
    assert out.shape == (BATCH, UNITS)
    print("KERNEL_OK")
</pallas_src>

<mosaic_0001>
module attributes {stable_mosaic.version = 11 : i64} {
  func.func @sarn_kernel(%arg0: i32, %arg1: memref<2x16x32xf32, #tpu.memory_space<vmem>>, %arg2: memref<224x64xbf16, #tpu.memory_space<vmem>>, %arg3: memref<21x32xf32, #tpu.memory_space<vmem>>, %arg4: memref<2x32xf32, #tpu.memory_space<vmem>>) attributes {dimension_semantics = [#tpu.dimension_semantics<arbitrary>], iteration_bounds = array<i64: 1>, scalar_prefetch = 0 : i64, scratch_operands = 0 : i64, tpu.core_type = #tpu.core_type<tc>, window_params = [{pipeline_mode = #tpu.pipeline_mode<synchronous>, transform_indices = @transform_0, window_bounds = array<i64: 2, 16, 32>}, {pipeline_mode = #tpu.pipeline_mode<synchronous>, transform_indices = @transform_1, window_bounds = array<i64: 224, 64>}, {pipeline_mode = #tpu.pipeline_mode<synchronous>, transform_indices = @transform_2, window_bounds = array<i64: 21, 32>}, {pipeline_mode = #tpu.pipeline_mode<synchronous>, transform_indices = @transform_3, window_bounds = array<i64: 2, 32>}]} {
    %c0 = arith.constant 0 : index
    %c0_0 = arith.constant 0 : index
    %c0_1 = arith.constant 0 : index
    %0 = vector.load %arg1[%c0, %c0_0, %c0_1] : memref<2x16x32xf32, #tpu.memory_space<vmem>>, vector<2x16x32xf32>
    %1 = vector.shape_cast %0 : vector<2x16x32xf32> to vector<32x32xf32>
    %c0_2 = arith.constant 0 : index
    %c0_3 = arith.constant 0 : index
    %2 = vector.load %arg2[%c0_2, %c0_3] : memref<224x64xbf16, #tpu.memory_space<vmem>>, vector<32x64xbf16>
    %c32 = arith.constant 32 : index
    %c0_4 = arith.constant 0 : index
    %3 = vector.load %arg2[%c32, %c0_4] : memref<224x64xbf16, #tpu.memory_space<vmem>>, vector<32x32xbf16>
    %c64 = arith.constant 64 : index
    %c0_5 = arith.constant 0 : index
    %4 = vector.load %arg2[%c64, %c0_5] : memref<224x64xbf16, #tpu.memory_space<vmem>>, vector<32x32xbf16>
    %c96 = arith.constant 96 : index
    %c0_6 = arith.constant 0 : index
    %5 = vector.load %arg2[%c96, %c0_6] : memref<224x64xbf16, #tpu.memory_space<vmem>>, vector<32x32xbf16>
    %c128 = arith.constant 128 : index
    %c0_7 = arith.constant 0 : index
    %6 = vector.load %arg2[%c128, %c0_7] : memref<224x64xbf16, #tpu.memory_space<vmem>>, vector<32x32xbf16>
    %c160 = arith.constant 160 : index
    %c0_8 = arith.constant 0 : index
    %7 = vector.load %arg2[%c160, %c0_8] : memref<224x64xbf16, #tpu.memory_space<vmem>>, vector<32x32xbf16>
    %c192 = arith.constant 192 : index
    %c0_9 = arith.constant 0 : index
    %8 = vector.load %arg2[%c192, %c0_9] : memref<224x64xbf16, #tpu.memory_space<vmem>>, vector<32x32xbf16>
    %c0_10 = arith.constant 0 : index
    %c0_11 = arith.constant 0 : index
    %9 = vector.load %arg3[%c0_10, %c0_11] : memref<21x32xf32, #tpu.memory_space<vmem>>, vector<1x32xf32>
    %c1 = arith.constant 1 : index
    %c0_12 = arith.constant 0 : index
    %10 = vector.load %arg3[%c1, %c0_12] : memref<21x32xf32, #tpu.memory_space<vmem>>, vector<1x32xf32>
    %c2 = arith.constant 2 : index
    %c0_13 = arith.constant 0 : index
    %11 = vector.load %arg3[%c2, %c0_13] : memref<21x32xf32, #tpu.memory_space<vmem>>, vector<1x32xf32>
    %c3 = arith.constant 3 : index
    %c0_14 = arith.constant 0 : index
    %12 = vector.load %arg3[%c3, %c0_14] : memref<21x32xf32, #tpu.memory_space<vmem>>, vector<1x32xf32>
    %c4 = arith.constant 4 : index
    %c0_15 = arith.constant 0 : index
    %13 = vector.load %arg3[%c4, %c0_15] : memref<21x32xf32, #tpu.memory_space<vmem>>, vector<1x32xf32>
    %c5 = arith.constant 5 : index
    %c0_16 = arith.constant 0 : index
    %14 = vector.load %arg3[%c5, %c0_16] : memref<21x32xf32, #tpu.memory_space<vmem>>, vector<1x32xf32>
    %c6 = arith.constant 6 : index
    %c0_17 = arith.constant 0 : index
    %15 = vector.load %arg3[%c6, %c0_17] : memref<21x32xf32, #tpu.memory_space<vmem>>, vector<1x32xf32>
    %c7 = arith.constant 7 : index
    %c0_18 = arith.constant 0 : index
    %16 = vector.load %arg3[%c7, %c0_18] : memref<21x32xf32, #tpu.memory_space<vmem>>, vector<1x32xf32>
    %c8 = arith.constant 8 : index
    %c0_19 = arith.constant 0 : index
    %17 = vector.load %arg3[%c8, %c0_19] : memref<21x32xf32, #tpu.memory_space<vmem>>, vector<1x32xf32>
    %c9 = arith.constant 9 : index
    %c0_20 = arith.constant 0 : index
    %18 = vector.load %arg3[%c9, %c0_20] : memref<21x32xf32, #tpu.memory_space<vmem>>, vector<1x32xf32>
    %c10 = arith.constant 10 : index
    %c0_21 = arith.constant 0 : index
    %19 = vector.load %arg3[%c10, %c0_21] : memref<21x32xf32, #tpu.memory_space<vmem>>, vector<1x32xf32>
    %c11 = arith.constant 11 : index
    %c0_22 = arith.constant 0 : index
    %20 = vector.load %arg3[%c11, %c0_22] : memref<21x32xf32, #tpu.memory_space<vmem>>, vector<1x32xf32>
    %c12 = arith.constant 12 : index
    %c0_23 = arith.constant 0 : index
    %21 = vector.load %arg3[%c12, %c0_23] : memref<21x32xf32, #tpu.memory_space<vmem>>, vector<1x32xf32>
    %c13 = arith.constant 13 : index
    %c0_24 = arith.constant 0 : index
    %22 = vector.load %arg3[%c13, %c0_24] : memref<21x32xf32, #tpu.memory_space<vmem>>, vector<1x32xf32>
    %c14 = arith.constant 14 : index
    %c0_25 = arith.constant 0 : index
    %23 = vector.load %arg3[%c14, %c0_25] : memref<21x32xf32, #tpu.memory_space<vmem>>, vector<1x32xf32>
    %c15 = arith.constant 15 : index
    %c0_26 = arith.constant 0 : index
    %24 = vector.load %arg3[%c15, %c0_26] : memref<21x32xf32, #tpu.memory_space<vmem>>, vector<1x32xf32>
    %c16 = arith.constant 16 : index
    %c0_27 = arith.constant 0 : index
    %25 = vector.load %arg3[%c16, %c0_27] : memref<21x32xf32, #tpu.memory_space<vmem>>, vector<1x32xf32>
    %c17 = arith.constant 17 : index
    %c0_28 = arith.constant 0 : index
    %26 = vector.load %arg3[%c17, %c0_28] : memref<21x32xf32, #tpu.memory_space<vmem>>, vector<1x32xf32>
    %c18 = arith.constant 18 : index
    %c0_29 = arith.constant 0 : index
    %27 = vector.load %arg3[%c18, %c0_29] : memref<21x32xf32, #tpu.memory_space<vmem>>, vector<1x32xf32>
    %c19 = arith.constant 19 : index
    %c0_30 = arith.constant 0 : index
    %28 = vector.load %arg3[%c19, %c0_30] : memref<21x32xf32, #tpu.memory_space<vmem>>, vector<2x32xf32>
    %29 = vector.extract_strided_slice %27 {offsets = [0, 0], sizes = [1, 1], strides = [1, 1]} : vector<1x32xf32> to vector<1x1xf32>
    %30 = arith.truncf %1 : vector<32x32xf32> to vector<32x32xbf16>
    %cst = arith.constant dense<0.000000e+00> : vector<32x64xf32>
    %31 = tpu.matmul %30, %2, %cst {dimension_numbers = #tpu.dot_dimension_numbers<[1], [0], [0], [1], [0, 0, 1, 1], [], []>} : vector<32x32xbf16>, vector<32x64xbf16>, vector<32x64xf32> -> vector<32x64xf32>
    %32 = vector.extract_strided_slice %31 {offsets = [0, 0], sizes = [32, 32], strides = [1, 1]} : vector<32x64xf32> to vector<32x32xf32>
    %33 = vector.broadcast %9 : vector<1x32xf32> to vector<32x32xf32>
    %34 = arith.addf %32, %33 : vector<32x32xf32>
    %cst_31 = arith.constant 0.000000e+00 : f32
    %35 = vector.broadcast %cst_31 : f32 to vector<32x32xf32>
    %36 = arith.maximumf %34, %35 : vector<32x32xf32>
    %37 = vector.extract_strided_slice %31 {offsets = [0, 32], sizes = [32, 32], strides = [1, 1]} : vector<32x64xf32> to vector<32x32xf32>
    %cst_32 = arith.constant dense<0.000000e+00> : vector<32xf32>
    %38 = vector.multi_reduction <add>, %36, %cst_32 [1] : vector<32x32xf32> to vector<32xf32>
    %39 = vector.shape_cast %38 : vector<32xf32> to vector<32x1xf32>
    %cst_33 = arith.constant 3.200000e+01 : f32
    %40 = vector.broadcast %cst_33 : f32 to vector<32x1xf32>
    %41 = arith.divf %39, %40 : vector<32x1xf32>
    %42 = vector.broadcast %41 : vector<32x1xf32> to vector<32x32xf32>
    %43 = arith.subf %36, %42 : vector<32x32xf32>
    %44 = arith.mulf %43, %43 : vector<32x32xf32>
    %cst_34 = arith.constant dense<0.000000e+00> : vector<32xf32>
    %45 = vector.multi_reduction <add>, %44, %cst_34 [1] : vector<32x32xf32> to vector<32xf32>
    %46 = vector.shape_cast %45 : vector<32xf32> to vector<32x1xf32>
    %cst_35 = arith.constant 3.200000e+01 : f32
    %47 = vector.broadcast %cst_35 : f32 to vector<32x1xf32>
    %48 = arith.divf %46, %47 : vector<32x1xf32>
    %49 = vector.broadcast %41 : vector<32x1xf32> to vector<32x32xf32>
    %50 = arith.subf %36, %49 : vector<32x32xf32>
    %cst_36 = arith.constant 9.99999974E-6 : f32
    %51 = vector.broadcast %cst_36 : f32 to vector<32x1xf32>
    %52 = arith.addf %48, %51 : vector<32x1xf32>
    %53 = math.rsqrt %52 : vector<32x1xf32>
    %54 = vector.broadcast %53 : vector<32x1xf32> to vector<32x32xf32>
    %55 = arith.mulf %50, %54 : vector<32x32xf32>
    %56 = vector.broadcast %10 : vector<1x32xf32> to vector<32x32xf32>
    %57 = arith.mulf %55, %56 : vector<32x32xf32>
    %58 = vector.broadcast %11 : vector<1x32xf32> to vector<32x32xf32>
    %59 = arith.addf %57, %58 : vector<32x32xf32>
    %60 = arith.truncf %59 : vector<32x32xf32> to vector<32x32xbf16>
    %cst_37 = arith.constant dense<0.000000e+00> : vector<32x32xf32>
    %61 = tpu.matmul %60, %3, %cst_37 {dimension_numbers = #tpu.dot_dimension_numbers<[1], [0], [0], [1], [0, 0, 1, 1], [], []>} : vector<32x32xbf16>, vector<32x32xbf16>, vector<32x32xf32> -> vector<32x32xf32>
    %62 = vector.broadcast %12 : vector<1x32xf32> to vector<32x32xf32>
    %63 = arith.addf %61, %62 : vector<32x32xf32>
    %cst_38 = arith.constant 0.000000e+00 : f32
    %64 = vector.broadcast %cst_38 : f32 to vector<32x32xf32>
    %65 = arith.maximumf %63, %64 : vector<32x32xf32>
    %cst_39 = arith.constant dense<0.000000e+00> : vector<32xf32>
    %66 = vector.multi_reduction <add>, %65, %cst_39 [1] : vector<32x32xf32> to vector<32xf32>
    %67 = vector.shape_cast %66 : vector<32xf32> to vector<32x1xf32>
    %cst_40 = arith.constant 3.200000e+01 : f32
    %68 = vector.broadcast %cst_40 : f32 to vector<32x1xf32>
    %69 = arith.divf %67, %68 : vector<32x1xf32>
    %70 = vector.broadcast %69 : vector<32x1xf32> to vector<32x32xf32>
    %71 = arith.subf %65, %70 : vector<32x32xf32>
    %72 = arith.mulf %71, %71 : vector<32x32xf32>
    %cst_41 = arith.constant dense<0.000000e+00> : vector<32xf32>
    %73 = vector.multi_reduction <add>, %72, %cst_41 [1] : vector<32x32xf32> to vector<32xf32>
    %74 = vector.shape_cast %73 : vector<32xf32> to vector<32x1xf32>
    %cst_42 = arith.constant 3.200000e+01 : f32
    %75 = vector.broadcast %cst_42 : f32 to vector<32x1xf32>
    %76 = arith.divf %74, %75 : vector<32x1xf32>
    %77 = vector.broadcast %69 : vector<32x1xf32> to vector<32x32xf32>
    %78 = arith.subf %65, %77 : vector<32x32xf32>
    %cst_43 = arith.constant 9.99999974E-6 : f32
    %79 = vector.broadcast %cst_43 : f32 to vector<32x1xf32>
    %80 = arith.addf %76, %79 : vector<32x1xf32>
    %81 = math.rsqrt %80 : vector<32x1xf32>
    %82 = vector.broadcast %81 : vector<32x1xf32> to vector<32x32xf32>
    %83 = arith.mulf %78, %82 : vector<32x32xf32>
    %84 = vector.broadcast %13 : vector<1x32xf32> to vector<32x32xf32>
    %85 = arith.mulf %83, %84 : vector<32x32xf32>
    %86 = vector.broadcast %14 : vector<1x32xf32> to vector<32x32xf32>
    %87 = arith.addf %85, %86 : vector<32x32xf32>
    %88 = vector.shape_cast %87 : vector<32x32xf32> to vector<2x16x32xf32>
    %89 = vector.shape_cast %15 : vector<1x32xf32> to vector<1x1x32xf32>
    %90 = vector.broadcast %89 : vector<1x1x32xf32> to vector<2x16x32xf32>
    %91 = arith.mulf %88, %90 : vector<2x16x32xf32>
    %cst_44 = arith.constant dense<0.000000e+00> : vector<2x16xf32>
    %92 = vector.multi_reduction <add>, %91, %cst_44 [2] : vector<2x16x32xf32> to vector<2x16xf32>
    %93 = vector.shape_cast %92 : vector<2x16xf32> to vector<2x16x1xf32>
    %94 = vector.shape_cast %29 : vector<1x1xf32> to vector<1x1x1xf32>
    %95 = vector.broadcast %94 : vector<1x1x1xf32> to vector<2x16x1xf32>
    %96 = arith.addf %93, %95 : vector<2x16x1xf32>
    %cst_45 = arith.constant 0.000000e+00 : f32
    %97 = vector.broadcast %cst_45 : f32 to vector<2x16x1xf32>
    %98 = arith.maximumf %96, %97 : vector<2x16x1xf32>
    %cst_46 = arith.constant dense<0xFF800000> : vector<2x1xf32>
    %99 = vector.multi_reduction <maximumf>, %98, %cst_46 [1] : vector<2x16x1xf32> to vector<2x1xf32>
    %100 = vector.shape_cast %99 : vector<2x1xf32> to vector<2x1x1xf32>
    %101 = vector.broadcast %100 : vector<2x1x1xf32> to vector<2x16x1xf32>
    %102 = arith.subf %98, %101 : vector<2x16x1xf32>
    %103 = math.exp %102 : vector<2x16x1xf32>
    %cst_47 = arith.constant dense<0.000000e+00> : vector<2x1xf32>
    %104 = vector.multi_reduction <add>, %103, %cst_47 [1] : vector<2x16x1xf32> to vector<2x1xf32>
    %105 = vector.shape_cast %104 : vector<2x1xf32> to vector<2x1x1xf32>
    %106 = vector.broadcast %105 : vector<2x1x1xf32> to vector<2x16x1xf32>
    %107 = arith.divf %103, %106 : vector<2x16x1xf32>
    %108 = vector.broadcast %107 : vector<2x16x1xf32> to vector<2x16x32xf32>
    %109 = arith.mulf %108, %0 : vector<2x16x32xf32>
    %cst_48 = arith.constant dense<0.000000e+00> : vector<2x32xf32>
    %110 = vector.multi_reduction <add>, %109, %cst_48 [1] : vector<2x16x32xf32> to vector<2x32xf32>
    %111 = arith.truncf %110 : vector<2x32xf32> to vector<2x32xbf16>
    %cst_49 = arith.constant dense<0.000000e+00> : vector<2x32xf32>
    %112 = tpu.matmul %111, %4, %cst_49 {dimension_numbers = #tpu.dot_dimension_numbers<[1], [0], [0], [1], [0, 0, 1, 1], [], []>} : vector<2x32xbf16>, vector<32x32xbf16>, vector<2x32xf32> -> vector<2x32xf32>
    %113 = vector.shape_cast %37 : vector<32x32xf32> to vector<2x16x32xf32>
    %114 = vector.shape_cast %112 : vector<2x32xf32> to vector<2x1x32xf32>
    %115 = vector.broadcast %114 : vector<2x1x32xf32> to vector<2x16x32xf32>
    %116 = arith.addf %113, %115 : vector<2x16x32xf32>
    %117 = vector.shape_cast %16 : vector<1x32xf32> to vector<1x1x32xf32>
    %118 = vector.broadcast %117 : vector<1x1x32xf32> to vector<2x16x32xf32>
    %119 = arith.addf %116, %118 : vector<2x16x32xf32>
    %cst_50 = arith.constant 0.000000e+00 : f32
    %120 = vector.broadcast %cst_50 : f32 to vector<2x16x32xf32>
    %121 = arith.maximumf %119, %120 : vector<2x16x32xf32>
    %122 = vector.shape_cast %121 : vector<2x16x32xf32> to vector<32x32xf32>
    %cst_51 = arith.constant dense<0.000000e+00> : vector<32xf32>
    %123 = vector.multi_reduction <add>, %122, %cst_51 [1] : vector<32x32xf32> to vector<32xf32>
    %124 = vector.shape_cast %123 : vector<32xf32> to vector<32x1xf32>
    %cst_52 = arith.constant 3.200000e+01 : f32
    %125 = vector.broadcast %cst_52 : f32 to vector<32x1xf32>
    %126 = arith.divf %124, %125 : vector<32x1xf32>
    %127 = vector.broadcast %126 : vector<32x1xf32> to vector<32x32xf32>
    %128 = arith.subf %122, %127 : vector<32x32xf32>
    %129 = arith.mulf %128, %128 : vector<32x32xf32>
    %cst_53 = arith.constant dense<0.000000e+00> : vector<32xf32>
    %130 = vector.multi_reduction <add>, %129, %cst_53 [1] : vector<32x32xf32> to vector<32xf32>
    %131 = vector.shape_cast %130 : vector<32xf32> to vector<32x1xf32>
    %cst_54 = arith.constant 3.200000e+01 : f32
    %132 = vector.broadcast %cst_54 : f32 to vector<32x1xf32>
    %133 = arith.divf %131, %132 : vector<32x1xf32>
    %134 = vector.broadcast %126 : vector<32x1xf32> to vector<32x32xf32>
    %135 = arith.subf %122, %134 : vector<32x32xf32>
    %cst_55 = arith.constant 9.99999974E-6 : f32
    %136 = vector.broadcast %cst_55 : f32 to vector<32x1xf32>
    %137 = arith.addf %133, %136 : vector<32x1xf32>
    %138 = math.rsqrt %137 : vector<32x1xf32>
    %139 = vector.broadcast %138 : vector<32x1xf32> to vector<32x32xf32>
    %140 = arith.mulf %135, %139 : vector<32x32xf32>
    %141 = vector.broadcast %17 : vector<1x32xf32> to vector<32x32xf32>
    %142 = arith.mulf %140, %141 : vector<32x32xf32>
    %143 = vector.broadcast %18 : vector<1x32xf32> to vector<32x32xf32>
    %144 = arith.addf %142, %143 : vector<32x32xf32>
    %145 = arith.truncf %144 : vector<32x32xf32> to vector<32x32xbf16>
    %cst_56 = arith.constant dense<0.000000e+00> : vector<32x32xf32>
    %146 = tpu.matmul %145, %5, %cst_56 {dimension_numbers = #tpu.dot_dimension_numbers<[1], [0], [0], [1], [0, 0, 1, 1], [], []>} : vector<32x32xbf16>, vector<32x32xbf16>, vector<32x32xf32> -> vector<32x32xf32>
    %147 = vector.broadcast %19 : vector<1x32xf32> to vector<32x32xf32>
    %148 = arith.addf %146, %147 : vector<32x32xf32>
    %cst_57 = arith.constant 0.000000e+00 : f32
    %149 = vector.broadcast %cst_57 : f32 to vector<32x32xf32>
    %150 = arith.maximumf %148, %149 : vector<32x32xf32>
    %cst_58 = arith.constant dense<0.000000e+00> : vector<32xf32>
    %151 = vector.multi_reduction <add>, %150, %cst_58 [1] : vector<32x32xf32> to vector<32xf32>
    %152 = vector.shape_cast %151 : vector<32xf32> to vector<32x1xf32>
    %cst_59 = arith.constant 3.200000e+01 : f32
    %153 = vector.broadcast %cst_59 : f32 to vector<32x1xf32>
    %154 = arith.divf %152, %153 : vector<32x1xf32>
    %155 = vector.broadcast %154 : vector<32x1xf32> to vector<32x32xf32>
    %156 = arith.subf %150, %155 : vector<32x32xf32>
    %157 = arith.mulf %156, %156 : vector<32x32xf32>
    %cst_60 = arith.constant dense<0.000000e+00> : vector<32xf32>
    %158 = vector.multi_reduction <add>, %157, %cst_60 [1] : vector<32x32xf32> to vector<32xf32>
    %159 = vector.shape_cast %158 : vector<32xf32> to vector<32x1xf32>
    %cst_61 = arith.constant 3.200000e+01 : f32
    %160 = vector.broadcast %cst_61 : f32 to vector<32x1xf32>
    %161 = arith.divf %159, %160 : vector<32x1xf32>
    %162 = vector.broadcast %154 : vector<32x1xf32> to vector<32x32xf32>
    %163 = arith.subf %150, %162 : vector<32x32xf32>
    %cst_62 = arith.constant 9.99999974E-6 : f32
    %164 = vector.broadcast %cst_62 : f32 to vector<32x1xf32>
    %165 = arith.addf %161, %164 : vector<32x1xf32>
    %166 = math.rsqrt %165 : vector<32x1xf32>
    %167 = vector.broadcast %166 : vector<32x1xf32> to vector<32x32xf32>
    %168 = arith.mulf %163, %167 : vector<32x32xf32>
    %169 = vector.broadcast %20 : vector<1x32xf32> to vector<32x32xf32>
    %170 = arith.mulf %168, %169 : vector<32x32xf32>
    %171 = vector.broadcast %21 : vector<1x32xf32> to vector<32x32xf32>
    %172 = arith.addf %170, %171 : vector<32x32xf32>
    %173 = arith.truncf %172 : vector<32x32xf32> to vector<32x32xbf16>
    %cst_63 = arith.constant dense<0.000000e+00> : vector<32x32xf32>
    %174 = tpu.matmul %173, %6, %cst_63 {dimension_numbers = #tpu.dot_dimension_numbers<[1], [0], [0], [1], [0, 0, 1, 1], [], []>} : vector<32x32xbf16>, vector<32x32xbf16>, vector<32x32xf32> -> vector<32x32xf32>
    %175 = vector.broadcast %22 : vector<1x32xf32> to vector<32x32xf32>
    %176 = arith.addf %174, %175 : vector<32x32xf32>
    %cst_64 = arith.constant 0.000000e+00 : f32
    %177 = vector.broadcast %cst_64 : f32 to vector<32x32xf32>
    %178 = arith.maximumf %176, %177 : vector<32x32xf32>
    %cst_65 = arith.constant dense<0.000000e+00> : vector<32xf32>
    %179 = vector.multi_reduction <add>, %178, %cst_65 [1] : vector<32x32xf32> to vector<32xf32>
    %180 = vector.shape_cast %179 : vector<32xf32> to vector<32x1xf32>
    %cst_66 = arith.constant 3.200000e+01 : f32
    %181 = vector.broadcast %cst_66 : f32 to vector<32x1xf32>
    %182 = arith.divf %180, %181 : vector<32x1xf32>
    %183 = vector.broadcast %182 : vector<32x1xf32> to vector<32x32xf32>
    %184 = arith.subf %178, %183 : vector<32x32xf32>
    %185 = arith.mulf %184, %184 : vector<32x32xf32>
    %cst_67 = arith.constant dense<0.000000e+00> : vector<32xf32>
    %186 = vector.multi_reduction <add>, %185, %cst_67 [1] : vector<32x32xf32> to vector<32xf32>
    %187 = vector.shape_cast %186 : vector<32xf32> to vector<32x1xf32>
    %cst_68 = arith.constant 3.200000e+01 : f32
    %188 = vector.broadcast %cst_68 : f32 to vector<32x1xf32>
    %189 = arith.divf %187, %188 : vector<32x1xf32>
    %190 = vector.broadcast %182 : vector<32x1xf32> to vector<32x32xf32>
    %191 = arith.subf %178, %190 : vector<32x32xf32>
    %cst_69 = arith.constant 9.99999974E-6 : f32
    %192 = vector.broadcast %cst_69 : f32 to vector<32x1xf32>
    %193 = arith.addf %189, %192 : vector<32x1xf32>
    %194 = math.rsqrt %193 : vector<32x1xf32>
    %195 = vector.broadcast %194 : vector<32x1xf32> to vector<32x32xf32>
    %196 = arith.mulf %191, %195 : vector<32x32xf32>
    %197 = vector.broadcast %23 : vector<1x32xf32> to vector<32x32xf32>
    %198 = arith.mulf %196, %197 : vector<32x32xf32>
    %199 = vector.broadcast %24 : vector<1x32xf32> to vector<32x32xf32>
    %200 = arith.addf %198, %199 : vector<32x32xf32>
    %201 = vector.shape_cast %200 : vector<32x32xf32> to vector<2x16x32xf32>
    %cst_70 = arith.constant dense<0.000000e+00> : vector<2x32xf32>
    %202 = vector.multi_reduction <add>, %201, %cst_70 [1] : vector<2x16x32xf32> to vector<2x32xf32>
    %203 = arith.truncf %202 : vector<2x32xf32> to vector<2x32xbf16>
    %cst_71 = arith.constant dense<0.000000e+00> : vector<2x32xf32>
    %204 = tpu.matmul %203, %7, %cst_71 {dimension_numbers = #tpu.dot_dimension_numbers<[1], [0], [0], [1], [0, 0, 1, 1], [], []>} : vector<2x32xbf16>, vector<32x32xbf16>, vector<2x32xf32> -> vector<2x32xf32>
    %205 = vector.broadcast %25 : vector<1x32xf32> to vector<2x32xf32>
    %206 = arith.addf %204, %205 : vector<2x32xf32>
    %cst_72 = arith.constant 0.000000e+00 : f32
    %207 = vector.broadcast %cst_72 : f32 to vector<2x32xf32>
    %208 = arith.maximumf %206, %207 : vector<2x32xf32>
    %209 = arith.truncf %208 : vector<2x32xf32> to vector<2x32xbf16>
    %cst_73 = arith.constant dense<0.000000e+00> : vector<2x32xf32>
    %210 = tpu.matmul %209, %8, %cst_73 {dimension_numbers = #tpu.dot_dimension_numbers<[1], [0], [0], [1], [0, 0, 1, 1], [], []>} : vector<2x32xbf16>, vector<32x32xbf16>, vector<2x32xf32> -> vector<2x32xf32>
    %211 = vector.broadcast %26 : vector<1x32xf32> to vector<2x32xf32>
    %212 = arith.addf %210, %211 : vector<2x32xf32>
    %213 = arith.mulf %212, %28 : vector<2x32xf32>
    %cst_74 = arith.constant 0.000000e+00 : f32
    %214 = vector.broadcast %cst_74 : f32 to vector<2x32xf32>
    %215 = arith.maximumf %213, %214 : vector<2x32xf32>
    %c0_75 = arith.constant 0 : index
    %c0_76 = arith.constant 0 : index
    %216 = vector.load %arg4[%c0_75, %c0_76] : memref<2x32xf32, #tpu.memory_space<vmem>>, vector<2x32xf32>
    tpu.vector_store %arg4[%c0_75, %c0_76], %215 {strides = array<i32>} : memref<2x32xf32, #tpu.memory_space<vmem>>, vector<2x32xf32>,
    return
  }
  func.func @transform_0(%arg0: i32) -> (i32, i32, i32) {
    %c0_i32 = arith.constant 0 : i32
    %c0_i32_0 = arith.constant 0 : i32
    %c0_i32_1 = arith.constant 0 : i32
    %c0_i32_2 = arith.constant 0 : i32
    return %c0_i32, %c0_i32_0, %c0_i32_1 : i32, i32, i32
  }
  func.func @transform_1(%arg0: i32) -> (i32, i32) {
    %c0_i32 = arith.constant 0 : i32
    %c0_i32_0 = arith.constant 0 : i32
    %c0_i32_1 = arith.constant 0 : i32
    return %c0_i32, %c0_i32_0 : i32, i32
  }
  func.func @transform_2(%arg0: i32) -> (i32, i32) {
    %c0_i32 = arith.constant 0 : i32
    %c0_i32_0 = arith.constant 0 : i32
    %c0_i32_1 = arith.constant 0 : i32
    return %c0_i32, %c0_i32_0 : i32, i32
  }
  func.func @transform_3(%arg0: i32) -> (i32, i32) {
    %c0_i32 = arith.constant 0 : i32
    %c0_i32_0 = arith.constant 0 : i32
    %c0_i32_1 = arith.constant 0 : i32
    return %c0_i32, %c0_i32_0 : i32, i32
  }
}

</mosaic_0001>

<bundles_post_ra>
// kernel: tpu_custom_call.1
= control target key start
LH: loop header
LB: loop body
LE: loop exit
PB: predicated region body
PF: predicated region fallthrough
CT: control target
= control target key end

     0   :  { %vm82_vm0 = vcmask 261120   ;;  %s1691_s0 = inlined_call_operand.vmem [shape: f32[2,16,32], index: 0, kind: input, shape index: {}]   ;;  %s1692_s1 = inlined_call_operand.vmem [shape: bf16[224,64], index: 1, kind: input, shape index: {}]   ;;  %s1693_s2 = inlined_call_operand.vmem [shape: f32[21,32], index: 2, kind: input, shape index: {}]   ;;  %s1694_s3 = inlined_call_operand.hbm [shape: f32[2,32], index: 3, kind: output, shape index: {}]  }
   0x1   :  { %v1316_v0 = vld [vmem:[%s1692_s1] sm:$0xff]   ;;  %v1317_v1 = vld [vmem:[%s1692_s1 + $0x8] sm:$0xff]   ;;  %v1454_v5 = vld [vmem:[%s1691_s0 + $0x10] sm:$0xff] }
   0x2   :  { %1251 = vmatprep.subr.bf16.mxu0 %v1316_v0  ;;  %v1442_v2 = vld [vmem:[%s1691_s0] sm:$0xff]  ;;  %v1447_v3 = vld [vmem:[%s1691_s0 + $0x8] sm:$0xff]  ;;  %v1459_v6 = vld [vmem:[%s1691_s0 + $0x18] sm:$0xff] }
   0x3   :  { %1252 = vmatpush3.bf16.msra.mxu0 %v1316_v0  ;;  %v68_v4 = vpack.c.bf16 %v1447_v3, %v1442_v2  ;;  %v69_v7 = vpack.c.bf16 %v1459_v6, %v1454_v5 }
   0x4   :  { %1253 = vmatprep.subr.bf16.mxu0 %v1317_v1 }
   0x5   :  { %1255 = vmatprep.mubr.msk.bf16.mxu0 %vm82_vm0, %v68_v4 }
   0x7   :  { %1254 = vmatpush3.bf16.msra.mxu0 %v1317_v1 }
   0xa   :  { %1256 = vmatmul.mubr.msk.bf16.vlgmr.msra.gmra.mrb[0].mxu0 %vm82_vm0, %v69_v7 }
   0xb   :  { %8 = vsyncpa [#allocation3], 0  ;;  %v1186_v8 = vld [vmem:[%s1693_s2] ss:$0 sm:$0xff]  ;;  %v1318_v45 = vld [vmem:[%s1692_s1 + $0x10] sm:$0xff]   ;;  %vm396_vm1 = vcmask 7168  }
   0xc   :  { %v1319_v46 = vld [vmem:[%s1692_s1 + $0x18] sm:$0xff]   ;;  %1259 = vmatprep.subr.bf16.mxu1 %v1318_v45  ;;  %v1187_v61 = vld [vmem:[%s1693_s2 + $0x1] ss:$0 sm:$0xff]  ;;  %v1188_v7 = vld [vmem:[%s1693_s2 + $0x2] ss:$0 sm:$0xff]  ;;  %vm1408_vm2 = vmmov 0  }
   0xd   :  { %1260 = vmatpush3.bf16.msra.mxu1 %v1318_v45  ;;  %vm499_vm3 = vcmask 1041409   ;;  %s1410_s20 = smov 32   ;;  %s1411_s23 = smov 96   ;;  %vm1166_vm4 = vcmask 254976  }
   0xe   :  { %1261 = vmatprep.subr.bf16.mxu1 %v1319_v46  ;;  %s1412_s5 = smov [#allocation2]  }
   0xf   :  { %s1174_s6 = sshll.u32 %s1412_s5, 4  ;;  %s1175_s6 = int_to_ptr.vmem [resolvable:$true] %s1174_s6 }
  0x10   :  { %s1382_s7 = scalar_lea.vmem %s1175_s6, 32  ;;  %p1387_p1 = scmp.lt.s32.totalorder %s1175_s6, %s1175_s6 }
  0x11   :  { %1262 = vmatpush3.bf16.msra.mxu1 %v1319_v46  ;;  %p1383_p0 = scmp.ne.s32.totalorder %s1175_s6, %s1382_s7  ;;  %p1388_p2 = scmp.lt.s32.totalorder %s1382_s7, %s1382_s7 }
  0x13   :  { %p1389_p3 = por %p1388_p2, %p1387_p1 }
  0x15   :  { %p1390_p4 = pnand %p1389_p3, %p1383_p0 }
  0xdd   :  { %v1468_v9 = vpop.f32.mrb[0].mxu0 }
  0xde   :  { %v144_v10 = vadd.f32 %v1468_v9, %v1186_v8  ;;  %v1471_v11 = vpop.f32.mrb[1].mxu0 }
  0xdf   :  { %v142_v12 = vadd.f32 %v1186_v8, %v1471_v11  ;;  %v1474_v13 = vpop.f32.mrb[2].mxu0 }
  0xe0   :  { %v145_v14 = vadd.f32 %v1474_v13, %v1186_v8  ;;  %v1477_v15 = vpop.f32.mrb[3].mxu0  ;;  %v148_v16 = vmax.f32 %v144_v10, 0.0 }
  0xe1   :  { %v143_v17 = vadd.f32 %v1186_v8, %v1477_v15  ;;  %v146_v18 = vmax.f32 %v142_v12, 0.0 }
  0xe2   :  { %v149_v19 = vmax.f32 %v145_v14, 0.0  ;;  %v156_v20 = vsel %vm82_vm0, %v148_v16, 0.0 }
  0xe3   :  { %v147_v21 = vmax.f32 %v143_v17, 0.0  ;;  %157 = vadd.xlane.f32.xlu1 %v156_v20  ;;  %v150_v22 = vsel %vm82_vm0, %v146_v18, 0.0 }
  0xe4   :  { %151 = vadd.xlane.f32.xlu0 %v150_v22  ;;  %v159_v23 = vsel %vm82_vm0, %v149_v19, 0.0 }
  0xe5   :  { %v153_v24 = vsel %vm82_vm0, %v147_v21, 0.0 }
  0xe7   :  { %160 = vadd.xlane.f32.xlu1 %v159_v23  ;;  %v1189_v23 = vld [vmem:[%s1693_s2 + $0x3] ss:$0 sm:$0xff] }
  0xe8   :  { %154 = vadd.xlane.f32.xlu0 %v153_v24 }
 0x170   :  { %v158_v25 = vpop.xlane.xlu1 %157 }
 0x171   :  { %v165_v26 = vmul.f32 0.03125, %v158_v25  ;;  %v152_v27 = vpop.xlane.xlu0 %151 }
 0x172   :  { %v163_v28 = vmul.f32 0.03125, %v152_v27 }
 0x173   :  { %v169_v29 = vsub.f32 %v148_v16, %v165_v26 }
 0x174   :  { %v167_v30 = vsub.f32 %v146_v18, %v163_v28  ;;  %v161_v31 = vpop.xlane.xlu1 %160 }
 0x175   :  { %v166_v32 = vmul.f32 0.03125, %v161_v31  ;;  %v155_v33 = vpop.xlane.xlu0 %154  ;;  %v173_v39 = vmul.f32 %v169_v29, %v169_v29 }
 0x176   :  { %v164_v34 = vmul.f32 0.03125, %v155_v33  ;;  %v171_v35 = vmul.f32 %v167_v30, %v167_v30 }
 0x177   :  { %v170_v36 = vsub.f32 %v149_v19, %v166_v32  ;;  %v181_v41 = vsel %vm82_vm0, %v173_v39, 0.0 }
 0x178   :  { %v168_v37 = vsub.f32 %v147_v21, %v164_v34  ;;  %v175_v38 = vsel %vm82_vm0, %v171_v35, 0.0 }
 0x179   :  { %176 = vadd.xlane.f32.xlu0 %v175_v38  ;;  %v174_v43 = vmul.f32 %v170_v36, %v170_v36 }
 0x17a   :  { %v172_v40 = vmul.f32 %v168_v37, %v168_v37 }
 0x17b   :  { %v184_v44 = vsel %vm82_vm0, %v174_v43, 0.0 }
 0x17c   :  { %v178_v42 = vsel %vm82_vm0, %v172_v40, 0.0 }
 0x17d   :  { %182 = vadd.xlane.f32.xlu0 %v181_v41  ;;  %179 = vadd.xlane.f32.xlu1 %v178_v42 }
 0x181   :  { %185 = vadd.xlane.f32.xlu1 %v184_v44 }
 0x206   :  { %v177_v47 = vpop.xlane.xlu0 %176 }
 0x207   :  { %v187_v48 = vmul.f32 0.03125, %v177_v47 }
 0x209   :  { %v191_v49 = vadd.f32 1e-05, %v187_v48 }
 0x20a   :  { %v180_v50 = vpop.xlane.xlu1 %179  ;;  %v183_v51 = vpop.xlane.xlu0 %182 }
 0x20b   :  { %1330 = vrsqrt.f32 %v191_v49  ;;  %v188_v52 = vmul.f32 0.03125, %v180_v50  ;;  %v189_v53 = vmul.f32 0.03125, %v183_v51 }
 0x20d   :  { %v192_v54 = vadd.f32 1e-05, %v188_v52  ;;  %v193_v55 = vadd.f32 1e-05, %v189_v53 }
 0x20e   :  { %v186_v56 = vpop.xlane.xlu1 %185 }
 0x20f   :  { %1332 = vrsqrt.f32 %v192_v54  ;;  %v190_v57 = vmul.f32 0.03125, %v186_v56 }
 0x210   :  { %1334 = vrsqrt.f32 %v193_v55 }
 0x211   :  { %v194_v58 = vadd.f32 1e-05, %v190_v57 }
 0x213   :  { %1336 = vrsqrt.f32 %v194_v58 }
 0x215   :  { %v1331_v59 = vpop.eup %1330 }
 0x216   :  { %v199_v60 = vmul.f32 %v1331_v59, %v167_v30 }
 0x218   :  { %v207_v1 = vmul.f32 %v1187_v61, %v199_v60 }
 0x219   :  { %v1333_v62 = vpop.eup %1332 }
 0x21a   :  { %v1335_v63 = vpop.eup %1334  ;;  %v200_v0 = vmul.f32 %v1333_v62, %v168_v37  ;;  %v215_v14 = vadd.f32 %v1188_v7, %v207_v1 }
 0x21b   :  { %v201_v4 = vmul.f32 %v1335_v63, %v169_v29 }
 0x21c   :  { %v208_v8 = vmul.f32 %v1187_v61, %v200_v0 }
 0x21d   :  { %v1337_v10 = vpop.eup %1336  ;;  %v209_v17 = vmul.f32 %v1187_v61, %v201_v4 }
 0x21e   :  { %v202_v12 = vmul.f32 %v1337_v10, %v170_v36  ;;  %v216_v16 = vadd.f32 %v1188_v7, %v208_v8 }
 0x21f   :  { %v217_v20 = vadd.f32 %v1188_v7, %v209_v17  ;;  %v1194_v17 = vld [vmem:[%s1693_s2 + $0x4] ss:$0 sm:$0xff] }
 0x220   :  { %v219_v18 = vpack.c.bf16 %v216_v16, %v215_v14  ;;  %v210_v19 = vmul.f32 %v1187_v61, %v202_v12 }
 0x222   :  { %1263 = vmatprep.mubr.msk.bf16.mxu1 %vm82_vm0, %v219_v18  ;;  %v218_v21 = vadd.f32 %v1188_v7, %v210_v19 }
 0x224   :  { %v220_v22 = vpack.c.bf16 %v218_v21, %v217_v20  ;;  %v1195_v20 = vld [vmem:[%s1693_s2 + $0x5] ss:$0 sm:$0xff] }
 0x226   :  { %1264 = vmatmul.mubr.msk.bf16.vlgmr.msra.gmra.mrb[0].mxu1 %vm82_vm0, %v220_v22 }
 0x2f9   :  { %v1265_v24 = vpop.f32.mrb[0].mxu1 }
 0x2fa   :  { %v277_v25 = vpop.f32.mrb[1].mxu1  ;;  %v286_v26 = vadd.f32 %v1265_v24, %v1189_v23  ;;  %v1196_v24 = vld [vmem:[%s1693_s2 + $0x6] ss:$0 sm:$0xff] }
 0x2fb   :  { %v278_v27 = vadd.f32 %v1189_v23, %v277_v25  ;;  %v1266_v28 = vpop.f32.mrb[2].mxu1 }
 0x2fc   :  { %v280_v29 = vpop.f32.mrb[3].mxu1  ;;  %v289_v31 = vadd.f32 %v1266_v28, %v1189_v23  ;;  %v294_v33 = vmax.f32 %v286_v26, 0.0 }
 0x2fd   :  { %v292_v30 = vmax.f32 %v278_v27, 0.0  ;;  %v281_v32 = vadd.f32 %v1189_v23, %v280_v29 }
 0x2fe   :  { %v295_v36 = vmax.f32 %v289_v31, 0.0  ;;  %v302_v38 = vsel %vm82_vm0, %v294_v33, 0.0 }
 0x2ff   :  { %v293_v34 = vmax.f32 %v281_v32, 0.0  ;;  %v296_v35 = vsel %vm82_vm0, %v292_v30, 0.0 }
 0x300   :  { %297 = vadd.xlane.f32.xlu0 %v296_v35  ;;  %v305_v39 = vsel %vm82_vm0, %v295_v36, 0.0 }
 0x301   :  { %v299_v37 = vsel %vm82_vm0, %v293_v34, 0.0 }
 0x302   :  { %300 = vadd.xlane.f32.xlu1 %v299_v37 }
 0x304   :  { %303 = vadd.xlane.f32.xlu0 %v302_v38 }
 0x306   :  { %306 = vadd.xlane.f32.xlu1 %v305_v39 }
 0x38d   :  { %v298_v40 = vpop.xlane.xlu0 %297 }
 0x38e   :  { %v308_v41 = vmul.f32 0.03125, %v298_v40 }
 0x38f   :  { %v301_v42 = vpop.xlane.xlu1 %300 }
 0x390   :  { %v312_v43 = vsub.f32 %v292_v30, %v308_v41  ;;  %v309_v44 = vmul.f32 0.03125, %v301_v42 }
 0x391   :  { %v304_v45 = vpop.xlane.xlu0 %303 }
 0x392   :  { %v313_v46 = vsub.f32 %v293_v34, %v309_v44  ;;  %v310_v47 = vmul.f32 0.03125, %v304_v45  ;;  %v316_v48 = vmul.f32 %v312_v43, %v312_v43  ;;  %v1197_v44 = vld [vmem:[%s1693_s2 + $0x12] ss:$0 sm:$0xff] }
 0x393   :  { %v307_v49 = vpop.xlane.xlu1 %306 }
 0x394   :  { %v314_v50 = vsub.f32 %v294_v33, %v310_v47  ;;  %v311_v51 = vmul.f32 0.03125, %v307_v49  ;;  %v320_v52 = vsel %vm82_vm0, %v316_v48, 0.0  ;;  %v317_v53 = vmul.f32 %v313_v46, %v313_v46 }
 0x395   :  { %321 = vadd.xlane.f32.xlu0 %v320_v52 }
 0x396   :  { %v315_v54 = vsub.f32 %v295_v36, %v311_v51  ;;  %v323_v55 = vsel %vm82_vm0, %v317_v53, 0.0  ;;  %v318_v56 = vmul.f32 %v314_v50, %v314_v50 }
 0x397   :  { %324 = vadd.xlane.f32.xlu1 %v323_v55 }
 0x398   :  { %v326_v57 = vsel %vm82_vm0, %v318_v56, 0.0  ;;  %v319_v58 = vmul.f32 %v315_v54, %v315_v54 }
 0x399   :  { %327 = vadd.xlane.f32.xlu0 %v326_v57 }
 0x39a   :  { %v329_v59 = vsel %vm82_vm0, %v319_v58, 0.0 }
 0x39b   :  { %330 = vadd.xlane.f32.xlu1 %v329_v59 }
 0x422   :  { %v322_v60 = vpop.xlane.xlu0 %321 }
 0x423   :  { %v332_v61 = vmul.f32 0.03125, %v322_v60 }
 0x424   :  { %v325_v62 = vpop.xlane.xlu1 %324 }
 0x425   :  { %v336_v63 = vadd.f32 1e-05, %v332_v61  ;;  %v333_v0 = vmul.f32 0.03125, %v325_v62 }
 0x426   :  { %v328_v1 = vpop.xlane.xlu0 %327 }
 0x427   :  { %1338 = vrsqrt.f32 %v336_v63  ;;  %v337_v4 = vadd.f32 1e-05, %v333_v0  ;;  %v334_v7 = vmul.f32 0.03125, %v328_v1 }
 0x428   :  { %v331_v8 = vpop.xlane.xlu1 %330 }
 0x429   :  { %1340 = vrsqrt.f32 %v337_v4  ;;  %v338_v10 = vadd.f32 1e-05, %v334_v7  ;;  %v335_v12 = vmul.f32 0.03125, %v331_v8 }
 0x42b   :  { %1342 = vrsqrt.f32 %v338_v10  ;;  %v339_v14 = vadd.f32 1e-05, %v335_v12 }
 0x42d   :  { %1344 = vrsqrt.f32 %v339_v14 }
 0x431   :  { %v1339_v16 = vpop.eup %1338 }
 0x432   :  { %v344_v18 = vmul.f32 %v1339_v16, %v312_v43  ;;  %v1406_v43 = vmov 0  }
 0x433   :  { %v1341_v19 = vpop.eup %1340  ;;  %1314 = vset.pattern.permute.xlu0 %v1406_v43  ;;  %1315 = vset.pattern.permute.xlu1 %v1406_v43 }
 0x434   :  { %v352_v21 = vmul.f32 %v1194_v17, %v344_v18  ;;  %v345_v22 = vmul.f32 %v1341_v19, %v313_v46 }
 0x435   :  { %v1343_v23 = vpop.eup %1342 }
 0x436   :  { %v360_v25 = vadd.f32 %v1195_v20, %v352_v21  ;;  %v353_v26 = vmul.f32 %v1194_v17, %v345_v22  ;;  %v346_v27 = vmul.f32 %v1343_v23, %v314_v50 }
 0x437   :  { %v1345_v28 = vpop.eup %1344 }
 0x438   :  { %v368_v29 = vmul.f32 %v1196_v24, %v360_v25  ;;  %v361_v30 = vadd.f32 %v1195_v20, %v353_v26  ;;  %v354_v31 = vmul.f32 %v1194_v17, %v346_v27  ;;  %v347_v32 = vmul.f32 %v1345_v28, %v315_v54 }
 0x43a   :  { %v372_v33 = vsel %vm82_vm0, %v368_v29, 0.0  ;;  %v369_v34 = vmul.f32 %v1196_v24, %v361_v30  ;;  %v362_v35 = vadd.f32 %v1195_v20, %v354_v31  ;;  %v355_v36 = vmul.f32 %v1194_v17, %v347_v32 }
 0x43b   :  { %373 = vadd.xlane.f32.xlu0 %v372_v33 }
 0x43c   :  { %v375_v37 = vsel %vm82_vm0, %v369_v34, 0.0  ;;  %v370_v38 = vmul.f32 %v1196_v24, %v362_v35  ;;  %v363_v39 = vadd.f32 %v1195_v20, %v355_v36 }
 0x43d   :  { %376 = vadd.xlane.f32.xlu1 %v375_v37 }
 0x43e   :  { %v378_v40 = vsel %vm82_vm0, %v370_v38, 0.0  ;;  %v371_v41 = vmul.f32 %v1196_v24, %v363_v39 }
 0x43f   :  { %379 = vadd.xlane.f32.xlu0 %v378_v40 }
 0x440   :  { %v381_v42 = vsel %vm82_vm0, %v371_v41, 0.0 }
 0x441   :  { %382 = vadd.xlane.f32.xlu1 %v381_v42 }
 0x4c8   :  { %v374_v45 = vpop.xlane.xlu0 %373 }
 0x4c9   :  { %v388_v46 = vadd.f32 %v1197_v44, %v374_v45 }
 0x4ca   :  { %v377_v47 = vpop.xlane.xlu1 %376 }
 0x4cb   :  { %v392_v48 = vmax.f32 %v388_v46, 0.0  ;;  %v389_v49 = vadd.f32 %v1197_v44, %v377_v47 }
 0x4cc   :  { %v380_v50 = vpop.xlane.xlu0 %379 }
 0x4cd   :  { %v393_v51 = vmax.f32 %v389_v49, 0.0  ;;  %v390_v52 = vadd.f32 %v1197_v44, %v380_v50  ;;  %v397_v54 = vsel %vm396_vm1, %v392_v48, -inf }
 0x4ce   :  { %v383_v53 = vpop.xlane.xlu1 %382 }
 0x4cf   :  { %v398_v55 = vsel %vm396_vm1, %v393_v51, -inf  ;;  %v394_v56 = vmax.f32 %v390_v52, 0.0  ;;  %v391_v57 = vadd.f32 %v1197_v44, %v383_v53 }
 0x4d0   :  { %v399_v58 = vmax.f32 %v397_v54, %v398_v55  ;;  %v1320_v55 = vld [vmem:[%s1692_s1 + $0x20] sm:$0xff]  }
 0x4d1   :  { %v395_v59 = vmax.f32 %v391_v57, 0.0  ;;  %v406_v61 = vsel %vm396_vm1, %v394_v56, -inf  ;;  %v1321_v57 = vld [vmem:[%s1692_s1 + $0x28] sm:$0xff]  }
 0x4d2   :  { %v400_v60 = vrot.slane %v399_v58, 4 }
 0x4d3   :  { %v407_v62 = vsel %vm396_vm1, %v395_v59, -inf }
 0x4d4   :  { %v401_v63 = vmax.f32 %v399_v58, %v400_v60  ;;  %v408_v0 = vmax.f32 %v406_v61, %v407_v62 }
 0x4d6   :  { %v402_v1 = vrot.slane %v401_v63, 2  ;;  %v409_v4 = vrot.slane %v408_v0, 4 }
 0x4d8   :  { %v403_v7 = vmax.f32 %v401_v63, %v402_v1  ;;  %v410_v8 = vmax.f32 %v408_v0, %v409_v4 }
 0x4da   :  { %v404_v10 = vrot.slane %v403_v7, 1  ;;  %v411_v12 = vrot.slane %v410_v8, 2 }
 0x4dc   :  { %v405_v14 = vmax.f32 %v403_v7, %v404_v10  ;;  %v412_v16 = vmax.f32 %v410_v8, %v411_v12 }
 0x4de   :  { %v415_v17 = vsub.f32 %v392_v48, %v405_v14  ;;  %v416_v18 = vsub.f32 %v393_v51, %v405_v14  ;;  %v413_v19 = vrot.slane %v412_v16, 1 }
 0x4e0   :  { %v419_v20 = vmul.f32 1.442695, %v415_v17  ;;  %v421_v21 = vmul.f32 1.442695, %v416_v18  ;;  %v414_v22 = vmax.f32 %v412_v16, %v413_v19 }
 0x4e2   :  { %1346 = vpow2.f32 %v419_v20  ;;  %v417_v23 = vsub.f32 %v394_v56, %v414_v22  ;;  %v418_v24 = vsub.f32 %v395_v59, %v414_v22  ;;  %v1407_v56 = vmov 0.0  }
 0x4e3   :  { %1348 = vpow2.f32 %v421_v21  ;;  %1267 = vmatprep.subr.bf16.mxu0 %v1407_v56  ;;  %1271 = vmatprep.mubr.msk.bf16.mxu0 %vm1408_vm2, %v1407_v56 }
 0x4e4   :  { %v423_v25 = vmul.f32 1.442695, %v417_v23  ;;  %v425_v26 = vmul.f32 1.442695, %v418_v24  ;;  %1268 = vmatpush3.bf16.msra.mxu0 %v1320_v55 }
 0x4e5   :  { %1269 = vmatprep.subr.bf16.mxu0 %v1407_v56 }
 0x4e6   :  { %1350 = vpow2.f32 %v423_v25 }
 0x4e7   :  { %1352 = vpow2.f32 %v425_v26 }
 0x4e8   :  { %1270 = vmatpush3.bf16.msra.mxu0 %v1321_v57 }
 0x4ec   :  { %v1347_v27 = vpop.eup %1346 }
 0x4ed   :  { %v1349_v28 = vpop.eup %1348  ;;  %v427_v29 = vsel %vm396_vm1, %v1347_v27, 0.0 }
 0x4ee   :  { %v428_v30 = vsel %vm396_vm1, %v1349_v28, 0.0 }
 0x4ef   :  { %v429_v31 = vadd.f32 %v428_v30, %v427_v29  ;;  %v1409_v30 = vmov 1966171168  }
 0x4f0   :  { %v1351_v32 = vpop.eup %1350 }
 0x4f1   :  { %v1353_v33 = vpop.eup %1352  ;;  %v430_v34 = vrot.slane %v429_v31, 4  ;;  %v436_v35 = vsel %vm396_vm1, %v1351_v32, 0.0 }
 0x4f2   :  { %v437_v36 = vsel %vm396_vm1, %v1353_v33, 0.0 }
 0x4f3   :  { %v431_v37 = vadd.f32 %v430_v34, %v429_v31  ;;  %v438_v38 = vadd.f32 %v437_v36, %v436_v35  ;;  %v559_v31 = vunpack.c.l.s4 %v1409_v30 }
 0x4f5   :  { %v439_v39 = vrot.slane %v438_v38, 4  ;;  %v432_v40 = vrot.slane %v431_v37, 2 }
 0x4f7   :  { %v440_v41 = vadd.f32 %v439_v39, %v438_v38  ;;  %v433_v42 = vadd.f32 %v432_v40, %v431_v37 }
 0x4f9   :  { %v434_v43 = vrot.slane %v433_v42, 1  ;;  %v441_v44 = vrot.slane %v440_v41, 2 }
 0x4fb   :  { %v435_v45 = vadd.f32 %v434_v43, %v433_v42  ;;  %v442_v46 = vadd.f32 %v441_v44, %v440_v41 }
 0x4fd   :  { %1354 = vrcp.f32 %v435_v45  ;;  %v443_v47 = vrot.slane %v442_v46, 1 }
 0x4ff   :  { %v444_v48 = vadd.f32 %v443_v47, %v442_v46  ;;  %v1201_v47 = vld [vmem:[%s1693_s2 + $0x7] ss:$0 sm:$0xff] }
 0x501   :  { %1356 = vrcp.f32 %v444_v48 }
 0x507   :  { %v1355_v49 = vpop.eup %1354 }
 0x508   :  { %v446_v50 = vmul.f32 %v1355_v49, %v1347_v27  ;;  %v447_v53 = vmul.f32 %v1355_v49, %v1349_v28 }
 0x50a   :  { %453 = vperm.xlu0 %1314, %v446_v50  }
 0x50b   :  { %v1357_v51 = vpop.eup %1356 }
 0x50c   :  { %v449_v52 = vmul.f32 %v1357_v51, %v1351_v32  ;;  %v450_v54 = vmul.f32 %v1357_v51, %v1353_v33  ;;  %v561_v32 = vlaneseq  ;;  %v560_v33 = vunpack.c.0.s8 %v559_v31 }
 0x50e   :  { %463 = vperm.xlu1 %1315, %v449_v52   ;;  %v562_v34 = vshrl.u32 %v561_v32, 7  ;;  %v1202_v32 = vld [vmem:[%s1693_s2 + $0x8] ss:$0 sm:$0xff] }
 0x510   :  { %v563_v35 = vsub.s32 %v560_v33, %v562_v34  ;;  %v582_v39 = vsub.s32 0, %v562_v34  ;;  %v1203_v33 = vld [vmem:[%s1693_s2 + $0x9] ss:$0 sm:$0xff]  ;;  %v1322_v34 = vld [vmem:[%s1692_s1 + $0x30] sm:$0xff]  }
 0x511   :  { %1275 = vmatprep.subr.bf16.mxu1 %v1322_v34 }
 0x512   :  { %458 = vperm.xlu1 %1315, %v447_v53   ;;  %1276 = vmatpush3.bf16.msra.mxu1 %v1322_v34 }
 0x516   :  { %468 = vperm.xlu1 %1315, %v450_v54  }
 0x589   :  { %v454_v58 = vpop.permute.xlu0 %453 }
 0x58a   :  { %v471_v60 = vmul.f32 %v454_v58, %v1442_v2 }
 0x58c   :  { %v475_v63 = vsel %vm82_vm0, %v471_v60, 0.0 }
 0x58d   :  { %v464_v59 = vpop.permute.xlu1 %463 }
 0x58e   :  { %v473_v0 = vmul.f32 %v464_v59, %v1454_v5 }
 0x590   :  { %v484_v12 = vsel %vm82_vm0, %v473_v0, 0.0 }
 0x591   :  { %v459_v61 = vpop.permute.xlu1 %458 }
 0x592   :  { %v472_v62 = vmul.f32 %v459_v61, %v1447_v3 }
 0x594   :  { %v476_v1 = vsel %vm82_vm0, %v472_v62, 0.0 }
 0x595   :  { %v477_v4 = vadd.f32 %v476_v1, %v475_v63  ;;  %v469_v7 = vpop.permute.xlu1 %468 }
 0x596   :  { %v474_v8 = vmul.f32 %v469_v7, %v1459_v6 }
 0x597   :  { %v478_v10 = vrot.slane %v477_v4, 4 }
 0x598   :  { %v485_v14 = vsel %vm82_vm0, %v474_v8, 0.0 }
 0x599   :  { %v479_v16 = vadd.f32 %v478_v10, %v477_v4  ;;  %v486_v2 = vadd.f32 %v485_v14, %v484_v12 }
 0x59b   :  { %v480_v17 = vrot.slane %v479_v16, 2  ;;  %v487_v18 = vrot.slane %v486_v2, 4 }
 0x59d   :  { %v481_v3 = vadd.f32 %v480_v17, %v479_v16  ;;  %v488_v19 = vadd.f32 %v487_v18, %v486_v2 }
 0x59f   :  { %v482_v20 = vrot.slane %v481_v3, 1  ;;  %v489_v21 = vrot.slane %v488_v19, 2 }
 0x5a1   :  { %v483_v5 = vadd.f32 %v482_v20, %v481_v3  ;;  %v490_v22 = vadd.f32 %v489_v21, %v488_v19 }
 0x5a3   :  { %v491_v23 = vrot.slane %v490_v22, 1  ;;  %v493_v24 = vpack.c.bf16 %v483_v5, %v483_v5 }
 0x5a5   :  { %v492_v25 = vadd.f32 %v491_v23, %v490_v22  ;;  %v497_v6 = vunpack.c.l.b16 %v493_v24 }
 0x5a7   :  { %v494_v26 = vpack.c.bf16 %v492_v25, %v492_v25 }
 0x5a9   :  { %v498_v27 = vunpack.c.l.b16 %v494_v26 }
 0x5ab   :  { %v500_v28 = vsel %vm499_vm3, %v498_v27, %v497_v6 }
 0x5ac   :  { %v501_v29 = vpack.c.b16 %v500_v28, %v500_v28 }
 0x5ae   :  { %1272 = vmatmul.mubr.msk.bf16.vlgmr.msra.gmra.mrb[4].mxu0 %vm82_vm0, %v501_v29 }
 0x681   :  { %v551_v36 = vpop.f32.mrb[4].mxu0 }
 0x682   :  { %v564_v37 = vrot.slane %v551_v36, %v563_v35  ;;  %v1273_v38 = vpop.f32.mrb[5].mxu0 }
 0x683   :  { %v554_v40 = vpop.f32.mrb[6].mxu0 }
 0x684   :  { %v565_v41 = vcombine.high %v564_v37, %v564_v37  ;;  %v572_v42 = vrot.slane %v564_v37, %v563_v35  ;;  %v1274_v43 = vpop.f32.mrb[7].mxu0 }
 0x686   :  { %v579_v44 = vrot.slane %v565_v41, %v563_v35  ;;  %v583_v45 = vrot.slane %v572_v42, %v582_v39  ;;  %v1323_v35 = vld [vmem:[%s1692_s1 + $0x38] sm:$0xff]  }
 0x687   :  { %1277 = vmatprep.subr.bf16.mxu1 %v1323_v35 }
 0x688   :  { %588 = vrot.lane.b32.xlu1 %v583_v45, %s1410_s20  ;;  %v587_v46 = vrot.slane %v579_v44, %v582_v39  ;;  %1278 = vmatpush3.bf16.msra.mxu1 %v1323_v35 }
 0x689   :  { %1291 = vmatprep.subr.bf16.mxu1 %v1407_v56 }
 0x68c   :  { %590 = vrot.lane.b32.xlu1 %v587_v46, %s1410_s20 }
 0x690   :  { %603 = vrot.lane.b32.xlu1 %v1201_v47, %s1410_s20 }
 0x6fa   :  { %v589_v48 = vpop.permute.xlu1 %588 }
 0x6fb   :  { %v594_v50 = vadd.f32 %v589_v48, %v1471_v11  ;;  %v595_v53 = vadd.f32 %v589_v48, %v1477_v15 }
 0x6fe   :  { %v591_v49 = vpop.permute.xlu1 %590 }
 0x6ff   :  { %v596_v51 = vadd.f32 %v1468_v9, %v591_v49  ;;  %v597_v60 = vadd.f32 %v1474_v13, %v591_v49 }
 0x702   :  { %v604_v52 = vpop.permute.xlu1 %603 }
 0x703   :  { %v608_v54 = vadd.f32 %v604_v52, %v596_v51  ;;  %v606_v55 = vadd.f32 %v604_v52, %v594_v50  ;;  %v607_v59 = vadd.f32 %v604_v52, %v595_v53  ;;  %v609_v62 = vadd.f32 %v604_v52, %v597_v60 }
 0x705   :  { %v612_v57 = vmax.f32 %v608_v54, 0.0  ;;  %v610_v58 = vmax.f32 %v606_v55, 0.0  ;;  %v611_v61 = vmax.f32 %v607_v59, 0.0  ;;  %v613_v9 = vmax.f32 %v609_v62, 0.0 }
 0x707   :  { %622 = vrot.lane.b32.xlu0 %v612_v57, %s1411_s23  ;;  %618 = vrot.lane.b32.xlu1 %v610_v58, %s1411_s23 }
 0x70b   :  { %620 = vrot.lane.b32.xlu1 %v611_v61, %s1411_s23 }
 0x70f   :  { %624 = vrot.lane.b32.xlu1 %v613_v9, %s1411_s23 }
 0x779   :  { %v619_v11 = vpop.permute.xlu1 %618  ;;  %v623_v63 = vpop.permute.xlu0 %622 }
 0x77a   :  { %v630_v15 = vsel %vm82_vm0, %v619_v11, 0.0  ;;  %v636_v13 = vsel %vm82_vm0, %v623_v63, 0.0 }
 0x77b   :  { %631 = vadd.xlane.f32.xlu0 %v630_v15 }
 0x77d   :  { %v621_v0 = vpop.permute.xlu1 %620 }
 0x77e   :  { %v633_v1 = vsel %vm82_vm0, %v621_v0, 0.0 }
 0x77f   :  { %637 = vadd.xlane.f32.xlu0 %v636_v13  ;;  %634 = vadd.xlane.f32.xlu1 %v633_v1 }
 0x781   :  { %v625_v4 = vpop.permute.xlu1 %624 }
 0x782   :  { %v639_v7 = vsel %vm82_vm0, %v625_v4, 0.0 }
 0x783   :  { %640 = vadd.xlane.f32.xlu0 %v639_v7  ;;  %v1204_v7 = vld [vmem:[%s1693_s2 + $0xa] ss:$0 sm:$0xff] }
 0x808   :  { %v632_v8 = vpop.xlane.xlu0 %631 }
 0x809   :  { %v642_v10 = vmul.f32 0.03125, %v632_v8 }
 0x80b   :  { %v646_v12 = vsub.f32 %v610_v58, %v642_v10 }
 0x80c   :  { %v638_v14 = vpop.xlane.xlu0 %637  ;;  %v635_v16 = vpop.xlane.xlu1 %634 }
 0x80d   :  { %v644_v2 = vmul.f32 0.03125, %v638_v14  ;;  %v643_v17 = vmul.f32 0.03125, %v635_v16  ;;  %v650_v18 = vmul.f32 %v646_v12, %v646_v12 }
 0x80f   :  { %v648_v3 = vsub.f32 %v612_v57, %v644_v2  ;;  %v647_v19 = vsub.f32 %v611_v61, %v643_v17  ;;  %658 = vrot.lane.b32.xlu1 %v650_v18, %s1411_s23 }
 0x810   :  { %v641_v20 = vpop.xlane.xlu0 %640 }
 0x811   :  { %v645_v21 = vmul.f32 0.03125, %v641_v20  ;;  %v652_v5 = vmul.f32 %v648_v3, %v648_v3  ;;  %v651_v22 = vmul.f32 %v647_v19, %v647_v19 }
 0x813   :  { %v649_v23 = vsub.f32 %v613_v9, %v645_v21  ;;  %662 = vrot.lane.b32.xlu1 %v652_v5, %s1411_s23  ;;  %660 = vrot.lane.b32.xlu0 %v651_v22, %s1411_s23 }
 0x815   :  { %v653_v24 = vmul.f32 %v649_v23, %v649_v23 }
 0x817   :  { %664 = vrot.lane.b32.xlu1 %v653_v24, %s1411_s23 }
 0x881   :  { %v659_v25 = vpop.permute.xlu1 %658 }
 0x882   :  { %v670_v26 = vsel %vm82_vm0, %v659_v25, 0.0 }
 0x883   :  { %671 = vadd.xlane.f32.xlu0 %v670_v26 }
 0x885   :  { %v661_v6 = vpop.permute.xlu0 %660  ;;  %v663_v27 = vpop.permute.xlu1 %662 }
 0x886   :  { %v673_v28 = vsel %vm82_vm0, %v661_v6, 0.0  ;;  %v676_v29 = vsel %vm82_vm0, %v663_v27, 0.0 }
 0x887   :  { %674 = vadd.xlane.f32.xlu1 %v673_v28  ;;  %677 = vadd.xlane.f32.xlu0 %v676_v29 }
 0x889   :  { %v665_v30 = vpop.permute.xlu1 %664 }
 0x88a   :  { %v679_v31 = vsel %vm82_vm0, %v665_v30, 0.0 }
 0x88b   :  { %680 = vadd.xlane.f32.xlu0 %v679_v31 }
 0x898   :  { %703 = vrot.lane.b32.xlu1 %v1202_v32, %s1410_s20 }
 0x8a1   :  { %715 = vrot.lane.b32.xlu0 %v1203_v33, %s1410_s20 }
 0x910   :  { %v672_v36 = vpop.xlane.xlu0 %671 }
 0x911   :  { %v682_v37 = vmul.f32 0.03125, %v672_v36 }
 0x913   :  { %v686_v38 = vadd.f32 1e-05, %v682_v37 }
 0x914   :  { %v678_v39 = vpop.xlane.xlu0 %677  ;;  %v675_v40 = vpop.xlane.xlu1 %674 }
 0x915   :  { %1358 = vrsqrt.f32 %v686_v38  ;;  %v684_v41 = vmul.f32 0.03125, %v678_v39  ;;  %v683_v42 = vmul.f32 0.03125, %v675_v40 }
 0x917   :  { %v688_v43 = vadd.f32 1e-05, %v684_v41  ;;  %v687_v44 = vadd.f32 1e-05, %v683_v42 }
 0x918   :  { %v681_v45 = vpop.xlane.xlu0 %680  ;;  %v704_v50 = vpop.permute.xlu1 %703 }
 0x919   :  { %1360 = vrsqrt.f32 %v688_v43  ;;  %v685_v46 = vmul.f32 0.03125, %v681_v45  ;;  %v1325_v45 = vld [vmem:[%s1692_s1 + $0x48] sm:$0xff]  }
 0x91a   :  { %1362 = vrsqrt.f32 %v687_v44  ;;  %v1324_v44 = vld [vmem:[%s1692_s1 + $0x40] sm:$0xff]  }
 0x91b   :  { %v689_v47 = vadd.f32 1e-05, %v685_v46  ;;  %1283 = vmatprep.subr.bf16.mxu0 %v1324_v44 }
 0x91c   :  { %v716_v57 = vpop.permute.xlu0 %715  ;;  %1284 = vmatpush3.bf16.msra.mxu0 %v1324_v44 }
 0x91d   :  { %1364 = vrsqrt.f32 %v689_v47  ;;  %1285 = vmatprep.subr.bf16.mxu0 %v1325_v45 }
 0x91f   :  { %v1359_v48 = vpop.eup %1358 }
 0x920   :  { %v694_v49 = vmul.f32 %v1359_v48, %v646_v12  ;;  %1286 = vmatpush3.bf16.msra.mxu0 %v1325_v45 }
 0x921   :  { %1299 = vmatprep.subr.bf16.mxu0 %v1407_v56 }
 0x922   :  { %v706_v55 = vmul.f32 %v704_v50, %v694_v49 }
 0x923   :  { %v1361_v51 = vpop.eup %1360 }
 0x924   :  { %v1363_v52 = vpop.eup %1362  ;;  %v696_v53 = vmul.f32 %v1361_v51, %v648_v3  ;;  %v718_v62 = vadd.f32 %v716_v57, %v706_v55 }
 0x925   :  { %v695_v54 = vmul.f32 %v1363_v52, %v647_v19 }
 0x926   :  { %v708_v61 = vmul.f32 %v704_v50, %v696_v53 }
 0x927   :  { %v1365_v58 = vpop.eup %1364  ;;  %v707_v59 = vmul.f32 %v704_v50, %v695_v54 }
 0x928   :  { %v697_v60 = vmul.f32 %v1365_v58, %v649_v23  ;;  %v720_v63 = vadd.f32 %v716_v57, %v708_v61 }
 0x929   :  { %v719_v9 = vadd.f32 %v716_v57, %v707_v59 }
 0x92a   :  { %v709_v11 = vmul.f32 %v704_v50, %v697_v60  ;;  %v1209_v60 = vld [vmem:[%s1693_s2 + $0xb] ss:$0 sm:$0xff] }
 0x92b   :  { %v722_v15 = vpack.c.bf16 %v719_v9, %v718_v62 }
 0x92c   :  { %v721_v0 = vadd.f32 %v716_v57, %v709_v11 }
 0x92d   :  { %730 = vrot.lane.b32.xlu1 %v722_v15, %s1411_s23 }
 0x92e   :  { %v723_v13 = vpack.c.bf16 %v721_v0, %v720_v63  ;;  %v1210_v63 = vld [vmem:[%s1693_s2 + $0xc] ss:$0 sm:$0xff] }
 0x931   :  { %732 = vrot.lane.b32.xlu1 %v723_v13, %s1411_s23 }
 0x99f   :  { %v731_v1 = vpop.permute.xlu1 %730 }
 0x9a0   :  { %1279 = vmatprep.mubr.msk.bf16.mxu1 %vm82_vm0, %v731_v1 }
 0x9a3   :  { %v733_v4 = vpop.permute.xlu1 %732 }
 0x9a4   :  { %1280 = vmatmul.mubr.msk.bf16.vlgmr.msra.gmra.mrb[4].mxu1 %vm82_vm0, %v733_v4 }
 0x9a5   :  { %1295 = vmatprep.mubr.msk.bf16.mxu1 %vm1408_vm2, %v1407_v56 }
 0xa77   :  { %v1281_v8 = vpop.f32.mrb[4].mxu1 }
 0xa78   :  { %v786_v10 = vpop.f32.mrb[5].mxu1  ;;  %v795_v12 = vadd.f32 %v1281_v8, %v1204_v7 }
 0xa79   :  { %v787_v14 = vadd.f32 %v1204_v7, %v786_v10  ;;  %v1282_v16 = vpop.f32.mrb[6].mxu1 }
 0xa7a   :  { %v789_v2 = vpop.f32.mrb[7].mxu1  ;;  %v803_v3 = vmax.f32 %v795_v12, 0.0  ;;  %v798_v19 = vadd.f32 %v1282_v16, %v1204_v7 }
 0xa7b   :  { %v801_v17 = vmax.f32 %v787_v14, 0.0  ;;  %v790_v18 = vadd.f32 %v1204_v7, %v789_v2 }
 0xa7c   :  { %v804_v22 = vmax.f32 %v798_v19, 0.0  ;;  %v811_v23 = vsel %vm82_vm0, %v803_v3, 0.0 }
 0xa7d   :  { %v802_v20 = vmax.f32 %v790_v18, 0.0  ;;  %v805_v21 = vsel %vm82_vm0, %v801_v17, 0.0  ;;  %v1211_v18 = vld [vmem:[%s1693_s2 + $0xd] ss:$0 sm:$0xff] }
 0xa7e   :  { %806 = vadd.xlane.f32.xlu0 %v805_v21  ;;  %v814_v24 = vsel %vm82_vm0, %v804_v22, 0.0 }
 0xa7f   :  { %v808_v5 = vsel %vm82_vm0, %v802_v20, 0.0 }
 0xa80   :  { %809 = vadd.xlane.f32.xlu1 %v808_v5 }
 0xa82   :  { %812 = vadd.xlane.f32.xlu0 %v811_v23 }
 0xa86   :  { %815 = vadd.xlane.f32.xlu0 %v814_v24 }
 0xb0b   :  { %v807_v25 = vpop.xlane.xlu0 %806 }
 0xb0c   :  { %v817_v26 = vmul.f32 0.03125, %v807_v25 }
 0xb0d   :  { %v810_v6 = vpop.xlane.xlu1 %809 }
 0xb0e   :  { %v821_v27 = vsub.f32 %v801_v17, %v817_v26  ;;  %v818_v28 = vmul.f32 0.03125, %v810_v6 }
 0xb0f   :  { %v813_v29 = vpop.xlane.xlu0 %812 }
 0xb10   :  { %v822_v30 = vsub.f32 %v802_v20, %v818_v28  ;;  %v819_v31 = vmul.f32 0.03125, %v813_v29  ;;  %v825_v32 = vmul.f32 %v821_v27, %v821_v27 }
 0xb12   :  { %v823_v33 = vsub.f32 %v803_v3, %v819_v31  ;;  %v829_v34 = vsel %vm82_vm0, %v825_v32, 0.0  ;;  %v826_v35 = vmul.f32 %v822_v30, %v822_v30 }
 0xb13   :  { %830 = vadd.xlane.f32.xlu1 %v829_v34  ;;  %v816_v36 = vpop.xlane.xlu0 %815 }
 0xb14   :  { %v820_v37 = vmul.f32 0.03125, %v816_v36  ;;  %v832_v38 = vsel %vm82_vm0, %v826_v35, 0.0  ;;  %v827_v39 = vmul.f32 %v823_v33, %v823_v33 }
 0xb15   :  { %833 = vadd.xlane.f32.xlu0 %v832_v38 }
 0xb16   :  { %v824_v40 = vsub.f32 %v804_v22, %v820_v37  ;;  %v835_v41 = vsel %vm82_vm0, %v827_v39, 0.0 }
 0xb17   :  { %836 = vadd.xlane.f32.xlu1 %v835_v41 }
 0xb18   :  { %v828_v42 = vmul.f32 %v824_v40, %v824_v40 }
 0xb1a   :  { %v838_v43 = vsel %vm82_vm0, %v828_v42, 0.0 }
 0xb1b   :  { %839 = vadd.xlane.f32.xlu0 %v838_v43 }
 0xba0   :  { %v831_v46 = vpop.xlane.xlu1 %830 }
 0xba1   :  { %v841_v47 = vmul.f32 0.03125, %v831_v46 }
 0xba2   :  { %v834_v48 = vpop.xlane.xlu0 %833 }
 0xba3   :  { %v845_v49 = vadd.f32 1e-05, %v841_v47  ;;  %v842_v50 = vmul.f32 0.03125, %v834_v48 }
 0xba4   :  { %v837_v51 = vpop.xlane.xlu1 %836 }
 0xba5   :  { %1366 = vrsqrt.f32 %v845_v49  ;;  %v846_v52 = vadd.f32 1e-05, %v842_v50  ;;  %v843_v53 = vmul.f32 0.03125, %v837_v51 }
 0xba7   :  { %1368 = vrsqrt.f32 %v846_v52  ;;  %v847_v54 = vadd.f32 1e-05, %v843_v53  ;;  %v1326_v52 = vld [vmem:[%s1692_s1 + $0x50] sm:$0xff]   ;;  %v1327_v53 = vld [vmem:[%s1692_s1 + $0x58] sm:$0xff]  }
 0xba8   :  { %v840_v55 = vpop.xlane.xlu0 %839  ;;  %1292 = vmatpush3.bf16.msra.mxu1 %v1326_v52 }
 0xba9   :  { %1370 = vrsqrt.f32 %v847_v54  ;;  %v844_v57 = vmul.f32 0.03125, %v840_v55  ;;  %1293 = vmatprep.subr.bf16.mxu1 %v1407_v56  ;;  %v1328_v54 = vld [vmem:[%s1692_s1 + $0x60] sm:$0xff]  }
 0xbab   :  { %v848_v58 = vadd.f32 1e-05, %v844_v57 }
 0xbac   :  { %1294 = vmatpush3.bf16.msra.mxu1 %v1327_v53 }
 0xbad   :  { %1372 = vrsqrt.f32 %v848_v58 }
 0xbaf   :  { %v1367_v59 = vpop.eup %1366 }
 0xbb0   :  { %v853_v61 = vmul.f32 %v1367_v59, %v821_v27 }
 0xbb1   :  { %v1369_v62 = vpop.eup %1368 }
 0xbb2   :  { %v854_v9 = vmul.f32 %v1369_v62, %v822_v30  ;;  %v861_v11 = vmul.f32 %v1209_v60, %v853_v61 }
 0xbb3   :  { %v1371_v15 = vpop.eup %1370 }
 0xbb4   :  { %v855_v0 = vmul.f32 %v1371_v15, %v823_v33  ;;  %v862_v13 = vmul.f32 %v1209_v60, %v854_v9  ;;  %v869_v1 = vadd.f32 %v1210_v63, %v861_v11 }
 0xbb6   :  { %v870_v4 = vadd.f32 %v1210_v63, %v862_v13  ;;  %v863_v8 = vmul.f32 %v1209_v60, %v855_v0 }
 0xbb7   :  { %v1373_v7 = vpop.eup %1372 }
 0xbb8   :  { %v856_v10 = vmul.f32 %v1373_v7, %v824_v40  ;;  %v873_v12 = vpack.c.bf16 %v870_v4, %v869_v1  ;;  %v871_v16 = vadd.f32 %v1210_v63, %v863_v8  ;;  %v1217_v7 = vld [vmem:[%s1693_s2 + $0xf] ss:$0 sm:$0xff] }
 0xbba   :  { %v864_v14 = vmul.f32 %v1209_v60, %v856_v10  ;;  %1287 = vmatprep.mubr.msk.bf16.mxu0 %vm82_vm0, %v873_v12 }
 0xbbc   :  { %v872_v2 = vadd.f32 %v1210_v63, %v864_v14 }
 0xbbe   :  { %v874_v17 = vpack.c.bf16 %v872_v2, %v871_v16 }
 0xbc0   :  { %1288 = vmatmul.mubr.msk.bf16.vlgmr.msra.gmra.mrb[8].mxu0 %vm82_vm0, %v874_v17 }
 0xbc1   :  { %1303 = vmatprep.mubr.msk.bf16.mxu0 %vm1408_vm2, %v1407_v56  ;;  %1300 = vmatpush3.bf16.msra.mxu0 %v1328_v54  ;;  %v1222_v54 = vld [vmem:[%s1693_s2 + $0x11] ss:$0 sm:$0xff] }
 0xbc2   :  { %1301 = vmatprep.subr.bf16.mxu0 %v1407_v56  ;;  %v1216_v56 = vld [vmem:[%s1693_s2 + $0xe] ss:$0 sm:$0xff] }
 0xc93   :  { %v1289_v3 = vpop.f32.mrb[8].mxu0 }
 0xc94   :  { %v931_v19 = vpop.f32.mrb[9].mxu0  ;;  %v940_v20 = vadd.f32 %v1289_v3, %v1211_v18 }
 0xc95   :  { %v932_v21 = vadd.f32 %v1211_v18, %v931_v19  ;;  %v1290_v5 = vpop.f32.mrb[10].mxu0 }
 0xc96   :  { %v934_v22 = vpop.f32.mrb[11].mxu0  ;;  %v943_v24 = vadd.f32 %v1290_v5, %v1211_v18  ;;  %v948_v26 = vmax.f32 %v940_v20, 0.0 }
 0xc97   :  { %v946_v23 = vmax.f32 %v932_v21, 0.0  ;;  %v935_v25 = vadd.f32 %v1211_v18, %v934_v22 }
 0xc98   :  { %v949_v28 = vmax.f32 %v943_v24, 0.0  ;;  %v956_v30 = vsel %vm82_vm0, %v948_v26, 0.0 }
 0xc99   :  { %v947_v6 = vmax.f32 %v935_v25, 0.0  ;;  %v950_v27 = vsel %vm82_vm0, %v946_v23, 0.0 }
 0xc9a   :  { %951 = vadd.xlane.f32.xlu1 %v950_v27  ;;  %v959_v31 = vsel %vm82_vm0, %v949_v28, 0.0 }
 0xc9b   :  { %v953_v29 = vsel %vm82_vm0, %v947_v6, 0.0 }
 0xc9c   :  { %954 = vadd.xlane.f32.xlu0 %v953_v29 }
 0xc9e   :  { %957 = vadd.xlane.f32.xlu1 %v956_v30 }
 0xca0   :  { %960 = vadd.xlane.f32.xlu0 %v959_v31 }
 0xd27   :  { %v952_v32 = vpop.xlane.xlu1 %951 }
 0xd28   :  { %v962_v33 = vmul.f32 0.03125, %v952_v32 }
 0xd29   :  { %v955_v34 = vpop.xlane.xlu0 %954 }
 0xd2a   :  { %v966_v35 = vsub.f32 %v946_v23, %v962_v33  ;;  %v963_v36 = vmul.f32 0.03125, %v955_v34 }
 0xd2b   :  { %v958_v37 = vpop.xlane.xlu1 %957 }
 0xd2c   :  { %v967_v38 = vsub.f32 %v947_v6, %v963_v36  ;;  %v964_v39 = vmul.f32 0.03125, %v958_v37  ;;  %v970_v40 = vmul.f32 %v966_v35, %v966_v35 }
 0xd2d   :  { %v961_v41 = vpop.xlane.xlu0 %960 }
 0xd2e   :  { %v968_v42 = vsub.f32 %v948_v26, %v964_v39  ;;  %v965_v43 = vmul.f32 0.03125, %v961_v41  ;;  %v974_v44 = vsel %vm82_vm0, %v970_v40, 0.0  ;;  %v971_v45 = vmul.f32 %v967_v38, %v967_v38 }
 0xd2f   :  { %975 = vadd.xlane.f32.xlu1 %v974_v44 }
 0xd30   :  { %v969_v46 = vsub.f32 %v949_v28, %v965_v43  ;;  %v977_v47 = vsel %vm82_vm0, %v971_v45, 0.0  ;;  %v972_v48 = vmul.f32 %v968_v42, %v968_v42  ;;  %v1329_v45 = vld [vmem:[%s1692_s1 + $0x68] sm:$0xff]  }
 0xd31   :  { %978 = vadd.xlane.f32.xlu0 %v977_v47  ;;  %1302 = vmatpush3.bf16.msra.mxu0 %v1329_v45 }
 0xd32   :  { %v980_v49 = vsel %vm82_vm0, %v972_v48, 0.0  ;;  %v973_v50 = vmul.f32 %v969_v46, %v969_v46 }
 0xd33   :  { %981 = vadd.xlane.f32.xlu1 %v980_v49 }
 0xd34   :  { %v983_v51 = vsel %vm82_vm0, %v973_v50, 0.0 }
 0xd35   :  { %984 = vadd.xlane.f32.xlu0 %v983_v51 }
 0xdbc   :  { %v976_v55 = vpop.xlane.xlu1 %975 }
 0xdbd   :  { %v986_v57 = vmul.f32 0.03125, %v976_v55  ;;  %v67_v55 = vld [vmem:[%s1693_s2 + $0x13] sm:$0x3] }
 0xdbe   :  { %v979_v58 = vpop.xlane.xlu0 %978 }
 0xdbf   :  { %v990_v59 = vadd.f32 1e-05, %v986_v57  ;;  %v987_v60 = vmul.f32 0.03125, %v979_v58 }
 0xdc0   :  { %v982_v61 = vpop.xlane.xlu1 %981 }
 0xdc1   :  { %1374 = vrsqrt.f32 %v990_v59  ;;  %v991_v62 = vadd.f32 1e-05, %v987_v60  ;;  %v988_v9 = vmul.f32 0.03125, %v982_v61 }
 0xdc2   :  { %v985_v11 = vpop.xlane.xlu0 %984 }
 0xdc3   :  { %1376 = vrsqrt.f32 %v991_v62  ;;  %v992_v15 = vadd.f32 1e-05, %v988_v9  ;;  %v989_v63 = vmul.f32 0.03125, %v985_v11 }
 0xdc5   :  { %1378 = vrsqrt.f32 %v992_v15  ;;  %v993_v0 = vadd.f32 1e-05, %v989_v63 }
 0xdc7   :  { %1380 = vrsqrt.f32 %v993_v0 }
 0xdcb   :  { %v1375_v13 = vpop.eup %1374 }
 0xdcc   :  { %v998_v1 = vmul.f32 %v1375_v13, %v966_v35 }
 0xdcd   :  { %v1377_v4 = vpop.eup %1376 }
 0xdce   :  { %v1006_v8 = vmul.f32 %v1216_v56, %v998_v1  ;;  %v999_v10 = vmul.f32 %v1377_v4, %v967_v38 }
 0xdcf   :  { %v1379_v12 = vpop.eup %1378 }
 0xdd0   :  { %v1014_v14 = vadd.f32 %v1217_v7, %v1006_v8  ;;  %v1007_v16 = vmul.f32 %v1216_v56, %v999_v10  ;;  %v1000_v2 = vmul.f32 %v1379_v12, %v968_v42 }
 0xdd1   :  { %v1381_v17 = vpop.eup %1380 }
 0xdd2   :  { %v1015_v18 = vadd.f32 %v1217_v7, %v1007_v16  ;;  %v1008_v3 = vmul.f32 %v1216_v56, %v1000_v2  ;;  %v1001_v19 = vmul.f32 %v1381_v17, %v969_v46  ;;  %v1018_v20 = vsel %vm82_vm0, %v1014_v14, 0.0  ;;  %v1218_v46 = vld [vmem:[%s1693_s2 + $0x10] ss:$0 sm:$0xff] }
 0xdd4   :  { %v1019_v21 = vsel %vm82_vm0, %v1015_v18, 0.0  ;;  %v1016_v5 = vadd.f32 %v1217_v7, %v1008_v3  ;;  %v1009_v22 = vmul.f32 %v1216_v56, %v1001_v19 }
 0xdd5   :  { %v1020_v23 = vadd.f32 %v1019_v21, %v1018_v20 }
 0xdd6   :  { %v1017_v24 = vadd.f32 %v1217_v7, %v1009_v22  ;;  %v1027_v26 = vsel %vm82_vm0, %v1016_v5, 0.0 }
 0xdd7   :  { %v1021_v25 = vrot.slane %v1020_v23, 4 }
 0xdd8   :  { %v1028_v6 = vsel %vm82_vm0, %v1017_v24, 0.0 }
 0xdd9   :  { %v1022_v27 = vadd.f32 %v1021_v25, %v1020_v23  ;;  %v1029_v28 = vadd.f32 %v1028_v6, %v1027_v26 }
 0xddb   :  { %v1030_v29 = vrot.slane %v1029_v28, 4  ;;  %v1023_v30 = vrot.slane %v1022_v27, 2 }
 0xddd   :  { %v1031_v31 = vadd.f32 %v1030_v29, %v1029_v28  ;;  %v1024_v32 = vadd.f32 %v1023_v30, %v1022_v27 }
 0xddf   :  { %v1025_v33 = vrot.slane %v1024_v32, 1  ;;  %v1032_v34 = vrot.slane %v1031_v31, 2 }
 0xde1   :  { %v1026_v35 = vadd.f32 %v1025_v33, %v1024_v32  ;;  %v1033_v36 = vadd.f32 %v1032_v34, %v1031_v31 }
 0xde3   :  { %v1034_v37 = vrot.slane %v1033_v36, 1  ;;  %v1036_v39 = vpack.c.bf16 %v1026_v35, %v1026_v35 }
 0xde5   :  { %v1035_v38 = vadd.f32 %v1034_v37, %v1033_v36  ;;  %v1044_v41 = vunpack.c.l.b16 %v1036_v39 }
 0xde7   :  { %v1037_v40 = vpack.c.bf16 %v1035_v38, %v1035_v38 }
 0xde9   :  { %v1045_v42 = vunpack.c.l.b16 %v1037_v40 }
 0xdeb   :  { %v1046_v43 = vsel %vm499_vm3, %v1045_v42, %v1044_v41 }
 0xdec   :  { %v1047_v44 = vpack.c.b16 %v1046_v43, %v1046_v43 }
 0xdee   :  { %1296 = vmatmul.mubr.msk.bf16.vlgmr.msra.gmra.mrb[8].mxu1 %vm82_vm0, %v1047_v44 }
 0xec1   :  { %v1097_v47 = vpop.f32.mrb[8].mxu1 }
 0xec2   :  { %v1098_v48 = vadd.f32 %v1218_v46, %v1097_v47  ;;  %v1297_v49 = vpop.f32.mrb[9].mxu1 }
 0xec3   :  { %v1100_v50 = vpop.f32.mrb[10].mxu1 }
 0xec4   :  { %v1103_v51 = vmax.f32 %v1098_v48, 0.0  ;;  %v1298_v52 = vpop.f32.mrb[11].mxu1 }
 0xec6   :  { %v1104_v53 = vpack.c.bf16 %v1103_v51, %v1103_v51 }
 0xec8   :  { %1304 = vmatmul.mubr.msk.bf16.vlgmr.msra.gmra.mrb[12].mxu0 %vm82_vm0, %v1104_v53 }
 0xf9b   :  { %v1158_v57 = vpop.f32.mrb[12].mxu0 }
 0xf9c   :  { %v1159_v58 = vadd.f32 %v1222_v54, %v1158_v57  ;;  %v1305_v59 = vpop.f32.mrb[13].mxu0 }
 0xf9d   :  { %v1161_v60 = vpop.f32.mrb[14].mxu0 }
 0xf9e   :  { %v1164_v61 = vmul.f32 %v1159_v58, %v67_v55  ;;  %v1306_v62 = vpop.f32.mrb[15].mxu0 }
 0xfa0   :  { %v1165_v9 = vmax.f32 %v1164_v61, 0.0 }
 0xfa2   :  { %1167 = vst.msk [vmem:[#allocation2] sm:$0x3] %vm1166_vm4, %v1165_v9 }
 0xfa3   :  { %1393 = shalt.err (!%p1390_p4)
}
 0xfa4   :  { %s1394_s9 = scalar_lea.hbm %s1694_s3, 32 }
 0xfa5   :  { %p1395_p5 = scmp.ne.s32.totalorder %s1694_s3, %s1394_s9  ;;  %p1398_p6 = scmp.lt.u32.totalorder %s1394_s9, %s1694_s3 }
 0xfa7   :  { %p1400_p7 = pnand %p1398_p6, %p1395_p5 }
 0xfa9   :  { %1403 = shalt.err (!%p1400_p7)
}
 0xfaa   :  { %1177 = dma.vmem_to_hbm [thread:$0]  %s1175_s6, 32, %s1694_s3, [#allocation3]  }
 0xfab   :  { %1404 = dma.done.wait [#allocation3], 32  }
 0xfac   :  { %1405 = vsyncadd [#allocation3], 4294967264 }
 0xfad   :  { %1181 = vsyncpa [#allocation3], 1 }

</bundles_post_ra>
